<compile_context>
chip_gen: v7x
topology: tpu7x:2x2x1
jax: 0.10.0
libtpu: 0.0.40
codegen_flags: <defaults>
</compile_context>

<pallas_src>
import functools

import jax
import jax.numpy as jnp
from jax.experimental import pallas as pl
from jax.experimental.pallas import tpu as pltpu


def _round_up(x, m):
    return ((x + m - 1) // m) * m


# ---------------------------------------------------------------------------
# Fused kernel: per time-chunk input projection + LSTM recurrence + heads
# ---------------------------------------------------------------------------
def _critic_fused_kernel(x_ref, w1T_ref, b1_ref, wihT_ref, bg_ref, whhT_ref,
                         wheadT_ref, bhead_ref, qr_ref,
                         gx_sc, h_sc, c_sc,
                         *, Tc, B_pad, H, T_actual, T_pad):
    t_chunk = pl.program_id(0)

    @pl.when(t_chunk == 0)
    def _():
        h_sc[...] = jnp.zeros_like(h_sc)
        c_sc[...] = jnp.zeros_like(c_sc)

    # --- hoisted input projection for the WHOLE chunk (MXU-friendly rows) ---
    x = x_ref[...]                                                 # (Tc*B_pad, D)
    h1 = jnp.dot(x, w1T_ref[...], preferred_element_type=jnp.float32)
    h1 = jnp.maximum(h1 + b1_ref[...], 0.0)                        # relu(dense1)
    gx = jnp.dot(h1.astype(wihT_ref.dtype), wihT_ref[...],
                 preferred_element_type=jnp.float32) + bg_ref[...]
    gx_sc[...] = gx                                                # f32 gates, VMEM only

    whhT = whhT_ref[...]

    # --- serial recurrence: only the small h @ W_hh^T stays in the loop ---
    def step(t, carry):
        h, c = carry
        row0 = pl.multiple_of(t * B_pad, 8)
        gates = gx_sc[pl.ds(row0, B_pad), :] + jnp.dot(
            h.astype(whhT.dtype), whhT, preferred_element_type=jnp.float32)
        # gate layout after wrapper-side reorder: [i, f, o, g]
        sig = jax.nn.sigmoid(gates[:, 0:3 * H])                    # one wide sigmoid
        i = sig[:, 0:H]
        f = sig[:, H:2 * H]
        o = sig[:, 2 * H:3 * H]
        g = jnp.tanh(gates[:, 3 * H:4 * H])
        c_new = f * c + i * g
        h_new = o * jnp.tanh(c_new)
        if T_pad != T_actual:
            # masked remainder: padded trailing steps leave (h, c) unchanged
            keep = ((t_chunk * Tc + t) < T_actual).astype(jnp.float32)
            h_new = keep * h_new + (1.0 - keep) * h
            c_new = keep * c_new + (1.0 - keep) * c
        return h_new, c_new

    h, c = jax.lax.fori_loop(0, Tc, step, (h_sc[...], c_sc[...]), unroll=True)
    h_sc[...] = h
    c_sc[...] = c

    # --- final step only: relu(h_T) and both heads as one lane-dense matmul ---
    @pl.when(t_chunk == pl.num_programs(0) - 1)
    def _():
        hr = jnp.maximum(h, 0.0)
        qr = jnp.dot(hr.astype(wheadT_ref.dtype), wheadT_ref[...],
                     preferred_element_type=jnp.float32) + bhead_ref[...]
        qr_ref[...] = qr.astype(qr_ref.dtype)


# ---------------------------------------------------------------------------
# Full CriticNetwork forward
# ---------------------------------------------------------------------------
def critic_network_forward(params, obs, action, *,
                           compute_dtype=jnp.bfloat16,
                           max_time_chunk=16):
    """obs: (B, T, obs_dim), action: (B, T, act_dim).  Returns (Q, r)."""
    obs_act = jnp.concatenate([obs, action], axis=-1)              # (B, T, D)
    B, T, D = obs_act.shape
    H = params["w_hh"].shape[1]
    out_dim = params["w2"].shape[0]
    n_head = 2 * out_dim

    # --- gate reorder: torch [i,f,g,o] -> [i,f,o,g] (contiguous sigmoid slab) ---
    perm = jnp.concatenate([jnp.arange(0, 2 * H),
                            jnp.arange(3 * H, 4 * H),
                            jnp.arange(2 * H, 3 * H)])
    w1T = params["w1"].T.astype(compute_dtype)                     # (D, H)
    wihT = params["w_ih"][perm].T.astype(compute_dtype)            # (H, 4H)
    whhT = params["w_hh"][perm].T.astype(compute_dtype)            # (H, 4H)
    b1_2 = params["b1"].reshape(1, H).astype(jnp.float32)
    bg_2 = (params["b_ih"] + params["b_hh"])[perm].reshape(1, 4 * H).astype(jnp.float32)

    # --- lane-dense heads: dense2|dense3 concatenated, zero-padded to >=128 lanes ---
    Nhp = max(128, _round_up(n_head, 128))
    wheadT = jnp.concatenate([params["w2"], params["w3"]], axis=0).T   # (H, n_head)
    wheadT_p = jnp.pad(wheadT, ((0, 0), (0, Nhp - n_head))).astype(compute_dtype)
    bhead = jnp.concatenate([params["b2"], params["b3"]], axis=0)
    bhead_p = jnp.pad(bhead, (0, Nhp - n_head)).reshape(1, Nhp).astype(jnp.float32)

    # --- time-major rows, batch padded to 8, time padded to a Tc multiple ---
    Tc = min(T, max_time_chunk)
    T_pad = _round_up(T, Tc)
    B_pad = _round_up(B, 8)
    x = jnp.transpose(obs_act, (1, 0, 2))                          # (T, B, D)
    if (T_pad, B_pad) != (T, B):
        x = jnp.pad(x, ((0, T_pad - T), (0, B_pad - B), (0, 0)))
    x = x.reshape(T_pad * B_pad, D).astype(compute_dtype)

    kernel = functools.partial(_critic_fused_kernel, Tc=Tc, B_pad=B_pad, H=H,
                               T_actual=T, T_pad=T_pad)

    qr = pl.pallas_call(
        kernel,
        out_shape=jax.ShapeDtypeStruct((B_pad, Nhp), jnp.float32),
        grid_spec=pltpu.PrefetchScalarGridSpec(
            num_scalar_prefetch=0,
            grid=(T_pad // Tc,),
            in_specs=[
                pl.BlockSpec((Tc * B_pad, D), lambda t: (t, 0)),   # obs_act chunk
                pl.BlockSpec((D, H), lambda t: (0, 0)),            # W1^T
                pl.BlockSpec((1, H), lambda t: (0, 0)),            # b1
                pl.BlockSpec((H, 4 * H), lambda t: (0, 0)),        # W_ih^T (reordered)
                pl.BlockSpec((1, 4 * H), lambda t: (0, 0)),        # b_ih + b_hh
                pl.BlockSpec((H, 4 * H), lambda t: (0, 0)),        # W_hh^T (reordered)
                pl.BlockSpec((H, Nhp), lambda t: (0, 0)),          # [W2|W3]^T padded
                pl.BlockSpec((1, Nhp), lambda t: (0, 0)),          # [b2|b3] padded
            ],
            out_specs=pl.BlockSpec((B_pad, Nhp), lambda t: (0, 0)),
            scratch_shapes=[
                pltpu.VMEM((Tc * B_pad, 4 * H), jnp.float32),      # f32 chunk gates
                pltpu.VMEM((B_pad, H), jnp.float32),               # resident h
                pltpu.VMEM((B_pad, H), jnp.float32),               # resident c
            ],
        ),
        compiler_params=pltpu.CompilerParams(
            dimension_semantics=("arbitrary",)),                   # serial recurrence
    )(x, w1T, b1_2, wihT, bg_2, whhT, wheadT_p, bhead_p)

    qr = qr[:B, :n_head].astype(obs.dtype)
    return qr[:, :out_dim], qr[:, out_dim:n_head]


# ---------------------------------------------------------------------------
# Pure-JAX reference (same math as the PyTorch module)
# ---------------------------------------------------------------------------
def ref_forward(params, obs, action):
    H = params["w_hh"].shape[1]
    x = jnp.concatenate([obs, action], axis=-1)
    hid = jax.nn.relu(jnp.einsum("btd,hd->bth", x, params["w1"]) + params["b1"])

    def step(carry, xt):
        h, c = carry
        gates = (xt @ params["w_ih"].T + params["b_ih"]
                 + h @ params["w_hh"].T + params["b_hh"])
        i = jax.nn.sigmoid(gates[:, :H])
        f = jax.nn.sigmoid(gates[:, H:2 * H])
        g = jnp.tanh(gates[:, 2 * H:3 * H])
        o = jax.nn.sigmoid(gates[:, 3 * H:])
        c_new = f * c + i * g
        h_new = o * jnp.tanh(c_new)
        return (h_new, c_new), None

    h0 = jnp.zeros((obs.shape[0], H), jnp.float32)
    (hT, _), _ = jax.lax.scan(step, (h0, h0), jnp.transpose(hid, (1, 0, 2)))
    hr = jax.nn.relu(hT)
    return (hr @ params["w2"].T + params["b2"],
            hr @ params["w3"].T + params["b3"])


# ---------------------------------------------------------------------------
if __name__ == "__main__":
    key = jax.random.PRNGKey(0)
    B, T = 4, 12
    obs_dim, act_dim, hidden, out_dim = 20, 12, 64, 1   # hidden fixed at 64 by module
    input_dim = obs_dim + act_dim

    ks = jax.random.split(key, 14)
    s = 0.1
    obs = jax.random.normal(ks[0], (B, T, obs_dim), jnp.float32)
    action = jax.random.normal(ks[1], (B, T, act_dim), jnp.float32)
    params = dict(
        w1=jax.random.normal(ks[2], (hidden, input_dim), jnp.float32) * s,
        b1=jax.random.normal(ks[3], (hidden,), jnp.float32) * s,
        w_ih=jax.random.normal(ks[4], (4 * hidden, hidden), jnp.float32) * s,
        w_hh=jax.random.normal(ks[5], (4 * hidden, hidden), jnp.float32) * s,
        b_ih=jax.random.normal(ks[6], (4 * hidden,), jnp.float32) * s,
        b_hh=jax.random.normal(ks[7], (4 * hidden,), jnp.float32) * s,
        w2=jax.random.normal(ks[8], (out_dim, hidden), jnp.float32) * s,
        b2=jax.random.normal(ks[9], (out_dim,), jnp.float32) * s,
        w3=jax.random.normal(ks[10], (out_dim, hidden), jnp.float32) * s,
        b3=jax.random.normal(ks[11], (out_dim,), jnp.float32) * s,
    )

    # --- exact-math path (f32 MXU operands) vs reference, tight tolerance ---
    fwd_f32 = jax.jit(functools.partial(critic_network_forward,
                                        compute_dtype=jnp.float32))
    Q, r = fwd_f32(params, obs, action)
    jax.block_until_ready((Q, r))
    assert Q.shape == (B, out_dim) and r.shape == (B, out_dim)
    Q_ref, r_ref = ref_forward(params, obs, action)
    assert jnp.allclose(Q, Q_ref, atol=2e-4, rtol=2e-4), "Q mismatch (f32)"
    assert jnp.allclose(r, r_ref, atol=2e-4, rtol=2e-4), "r mismatch (f32)"

    # --- default path: bf16 MXU operands, f32 gates/state (loose tolerance) ---
    fwd_def = jax.jit(critic_network_forward)
    Qb, rb = fwd_def(params, obs, action)
    jax.block_until_ready((Qb, rb))
    assert jnp.allclose(Qb, Q_ref, atol=5e-2, rtol=5e-2), "Q mismatch (bf16)"
    assert jnp.allclose(rb, r_ref, atol=5e-2, rtol=5e-2), "r mismatch (bf16)"

    # --- ragged shapes: exercises batch padding + masked time-remainder chunk ---
    B2, T2 = 3, 7
    obs2 = jax.random.normal(ks[12], (B2, T2, obs_dim), jnp.float32)
    act2 = jax.random.normal(ks[13], (B2, T2, act_dim), jnp.float32)
    fwd_rag = jax.jit(functools.partial(critic_network_forward,
                                        compute_dtype=jnp.float32,
                                        max_time_chunk=4))
    Q2, r2 = fwd_rag(params, obs2, act2)
    jax.block_until_ready((Q2, r2))
    Q2_ref, r2_ref = ref_forward(params, obs2, act2)
    assert jnp.allclose(Q2, Q2_ref, atol=2e-4, rtol=2e-4), "Q mismatch (ragged)"
    assert jnp.allclose(r2, r2_ref, atol=2e-4, rtol=2e-4), "r mismatch (ragged)"

    print("KERNEL_OK")
</pallas_src>

<mosaic_0001>
module attributes {stable_mosaic.version = 11 : i64} {
  func.func @_critic_fused_kernel(%arg0: i32, %arg1: memref<96x32xf32, #tpu.memory_space<vmem>>, %arg2: memref<32x64xf32, #tpu.memory_space<vmem>>, %arg3: memref<1x64xf32, #tpu.memory_space<vmem>>, %arg4: memref<64x256xf32, #tpu.memory_space<vmem>>, %arg5: memref<1x256xf32, #tpu.memory_space<vmem>>, %arg6: memref<64x256xf32, #tpu.memory_space<vmem>>, %arg7: memref<64x128xf32, #tpu.memory_space<vmem>>, %arg8: memref<1x128xf32, #tpu.memory_space<vmem>>, %arg9: memref<8x128xf32, #tpu.memory_space<vmem>>, %arg10: memref<96x256xf32, #tpu.memory_space<vmem>>, %arg11: memref<8x64xf32, #tpu.memory_space<vmem>>, %arg12: memref<8x64xf32, #tpu.memory_space<vmem>>) attributes {dimension_semantics = [#tpu.dimension_semantics<arbitrary>], iteration_bounds = array<i64: 1>, scalar_prefetch = 0 : i64, scratch_operands = 3 : i64, tpu.core_type = #tpu.core_type<tc>, window_params = [{transform_indices = @transform_0, window_bounds = array<i64: 96, 32>}, {pipeline_mode = #tpu.pipeline_mode<synchronous>, transform_indices = @transform_1, window_bounds = array<i64: 32, 64>}, {pipeline_mode = #tpu.pipeline_mode<synchronous>, transform_indices = @transform_2, window_bounds = array<i64: 1, 64>}, {pipeline_mode = #tpu.pipeline_mode<synchronous>, transform_indices = @transform_3, window_bounds = array<i64: 64, 256>}, {pipeline_mode = #tpu.pipeline_mode<synchronous>, transform_indices = @transform_4, window_bounds = array<i64: 1, 256>}, {pipeline_mode = #tpu.pipeline_mode<synchronous>, transform_indices = @transform_5, window_bounds = array<i64: 64, 256>}, {pipeline_mode = #tpu.pipeline_mode<synchronous>, transform_indices = @transform_6, window_bounds = array<i64: 64, 128>}, {pipeline_mode = #tpu.pipeline_mode<synchronous>, transform_indices = @transform_7, window_bounds = array<i64: 1, 128>}, {pipeline_mode = #tpu.pipeline_mode<synchronous>, transform_indices = @transform_8, window_bounds = array<i64: 8, 128>}]} {
    %c0_i32 = arith.constant 0 : i32
    %0 = arith.cmpi eq, %arg0, %c0_i32 : i32
    %1 = arith.extui %0 : i1 to i32
    %c0_i32_0 = arith.constant 0 : i32
    %2 = arith.cmpi ne, %1, %c0_i32_0 : i32
    scf.if %2 {
      %cst_75 = arith.constant 0.000000e+00 : f32
      %289 = vector.broadcast %cst_75 : f32 to vector<8x64xf32>
      %c0_76 = arith.constant 0 : index
      %c0_77 = arith.constant 0 : index
      %290 = vector.load %arg11[%c0_76, %c0_77] : memref<8x64xf32, #tpu.memory_space<vmem>>, vector<8x64xf32>
      tpu.vector_store %arg11[%c0_76, %c0_77], %289 {strides = array<i32>} : memref<8x64xf32, #tpu.memory_space<vmem>>, vector<8x64xf32>,
      %cst_78 = arith.constant 0.000000e+00 : f32
      %291 = vector.broadcast %cst_78 : f32 to vector<8x64xf32>
      %c0_79 = arith.constant 0 : index
      %c0_80 = arith.constant 0 : index
      %292 = vector.load %arg12[%c0_79, %c0_80] : memref<8x64xf32, #tpu.memory_space<vmem>>, vector<8x64xf32>
      tpu.vector_store %arg12[%c0_79, %c0_80], %291 {strides = array<i32>} : memref<8x64xf32, #tpu.memory_space<vmem>>, vector<8x64xf32>,
    } else {
    }
    %c0 = arith.constant 0 : index
    %c0_1 = arith.constant 0 : index
    %3 = vector.load %arg1[%c0, %c0_1] : memref<96x32xf32, #tpu.memory_space<vmem>>, vector<96x32xf32>
    %c0_2 = arith.constant 0 : index
    %c0_3 = arith.constant 0 : index
    %4 = vector.load %arg2[%c0_2, %c0_3] : memref<32x64xf32, #tpu.memory_space<vmem>>, vector<32x64xf32>
    %cst = arith.constant dense<0.000000e+00> : vector<96x64xf32>
    %5 = tpu.matmul %3, %4, %cst {dimension_numbers = #tpu.dot_dimension_numbers<[1], [0], [0], [1], [0, 0, 1, 1], [], []>} : vector<96x32xf32>, vector<32x64xf32>, vector<96x64xf32> -> vector<96x64xf32>
    %c0_4 = arith.constant 0 : index
    %c0_5 = arith.constant 0 : index
    %6 = vector.load %arg3[%c0_4, %c0_5] : memref<1x64xf32, #tpu.memory_space<vmem>>, vector<1x64xf32>
    %7 = vector.broadcast %6 : vector<1x64xf32> to vector<96x64xf32>
    %8 = arith.addf %5, %7 : vector<96x64xf32>
    %cst_6 = arith.constant 0.000000e+00 : f32
    %9 = vector.broadcast %cst_6 : f32 to vector<96x64xf32>
    %10 = arith.maximumf %8, %9 : vector<96x64xf32>
    %c0_7 = arith.constant 0 : index
    %c0_8 = arith.constant 0 : index
    %11 = vector.load %arg4[%c0_7, %c0_8] : memref<64x256xf32, #tpu.memory_space<vmem>>, vector<64x256xf32>
    %cst_9 = arith.constant dense<0.000000e+00> : vector<96x256xf32>
    %12 = tpu.matmul %10, %11, %cst_9 {dimension_numbers = #tpu.dot_dimension_numbers<[1], [0], [0], [1], [0, 0, 1, 1], [], []>} : vector<96x64xf32>, vector<64x256xf32>, vector<96x256xf32> -> vector<96x256xf32>
    %c0_10 = arith.constant 0 : index
    %c0_11 = arith.constant 0 : index
    %13 = vector.load %arg5[%c0_10, %c0_11] : memref<1x256xf32, #tpu.memory_space<vmem>>, vector<1x256xf32>
    %14 = vector.broadcast %13 : vector<1x256xf32> to vector<96x256xf32>
    %15 = arith.addf %12, %14 : vector<96x256xf32>
    %c0_12 = arith.constant 0 : index
    %c0_13 = arith.constant 0 : index
    %16 = vector.load %arg10[%c0_12, %c0_13] : memref<96x256xf32, #tpu.memory_space<vmem>>, vector<96x256xf32>
    tpu.vector_store %arg10[%c0_12, %c0_13], %15 {strides = array<i32>} : memref<96x256xf32, #tpu.memory_space<vmem>>, vector<96x256xf32>,
    %c0_14 = arith.constant 0 : index
    %c0_15 = arith.constant 0 : index
    %17 = vector.load %arg6[%c0_14, %c0_15] : memref<64x256xf32, #tpu.memory_space<vmem>>, vector<64x256xf32>
    %c0_16 = arith.constant 0 : index
    %c0_17 = arith.constant 0 : index
    %18 = vector.load %arg11[%c0_16, %c0_17] : memref<8x64xf32, #tpu.memory_space<vmem>>, vector<8x64xf32>
    %c0_18 = arith.constant 0 : index
    %c0_19 = arith.constant 0 : index
    %19 = vector.load %arg12[%c0_18, %c0_19] : memref<8x64xf32, #tpu.memory_space<vmem>>, vector<8x64xf32>
    %c0_i32_20 = arith.constant 0 : i32
    %c8_i32 = arith.constant 8 : i32
    %20 = arith.muli %c0_i32_20, %c8_i32 : i32
    %21 = tpu.assume_multiple %20, 8 : i32
    %22 = arith.index_cast %21 : i32 to index
    %c0_21 = arith.constant 0 : index
    %23 = vector.load %arg10[%22, %c0_21] : memref<96x256xf32, #tpu.memory_space<vmem>>, vector<8x256xf32>
    %cst_22 = arith.constant dense<0.000000e+00> : vector<8x256xf32>
    %24 = tpu.matmul %18, %17, %cst_22 {dimension_numbers = #tpu.dot_dimension_numbers<[1], [0], [0], [1], [0, 0, 1, 1], [], []>} : vector<8x64xf32>, vector<64x256xf32>, vector<8x256xf32> -> vector<8x256xf32>
    %25 = arith.addf %23, %24 : vector<8x256xf32>
    %26 = vector.extract_strided_slice %25 {offsets = [0, 0], sizes = [8, 192], strides = [1, 1]} : vector<8x256xf32> to vector<8x192xf32>
    %27 = arith.negf %26 : vector<8x192xf32>
    %28 = math.exp %27 : vector<8x192xf32>
    %cst_23 = arith.constant 1.000000e+00 : f32
    %29 = vector.broadcast %cst_23 : f32 to vector<8x192xf32>
    %30 = arith.addf %29, %28 : vector<8x192xf32>
    %31 = arith.divf %29, %30 : vector<8x192xf32>
    %32 = vector.extract_strided_slice %31 {offsets = [0, 0], sizes = [8, 64], strides = [1, 1]} : vector<8x192xf32> to vector<8x64xf32>
    %33 = vector.extract_strided_slice %31 {offsets = [0, 64], sizes = [8, 64], strides = [1, 1]} : vector<8x192xf32> to vector<8x64xf32>
    %34 = vector.extract_strided_slice %31 {offsets = [0, 128], sizes = [8, 64], strides = [1, 1]} : vector<8x192xf32> to vector<8x64xf32>
    %35 = vector.extract_strided_slice %25 {offsets = [0, 192], sizes = [8, 64], strides = [1, 1]} : vector<8x256xf32> to vector<8x64xf32>
    %36 = math.tanh %35 : vector<8x64xf32>
    %37 = arith.mulf %33, %19 : vector<8x64xf32>
    %38 = arith.mulf %32, %36 : vector<8x64xf32>
    %39 = arith.addf %37, %38 : vector<8x64xf32>
    %40 = math.tanh %39 : vector<8x64xf32>
    %41 = arith.mulf %34, %40 : vector<8x64xf32>
    %c1_i32 = arith.constant 1 : i32
    %c8_i32_24 = arith.constant 8 : i32
    %42 = arith.muli %c1_i32, %c8_i32_24 : i32
    %43 = tpu.assume_multiple %42, 8 : i32
    %44 = arith.index_cast %43 : i32 to index
    %c0_25 = arith.constant 0 : index
    %45 = vector.load %arg10[%44, %c0_25] : memref<96x256xf32, #tpu.memory_space<vmem>>, vector<8x256xf32>
    %cst_26 = arith.constant dense<0.000000e+00> : vector<8x256xf32>
    %46 = tpu.matmul %41, %17, %cst_26 {dimension_numbers = #tpu.dot_dimension_numbers<[1], [0], [0], [1], [0, 0, 1, 1], [], []>} : vector<8x64xf32>, vector<64x256xf32>, vector<8x256xf32> -> vector<8x256xf32>
    %47 = arith.addf %45, %46 : vector<8x256xf32>
    %48 = vector.extract_strided_slice %47 {offsets = [0, 0], sizes = [8, 192], strides = [1, 1]} : vector<8x256xf32> to vector<8x192xf32>
    %49 = arith.negf %48 : vector<8x192xf32>
    %50 = math.exp %49 : vector<8x192xf32>
    %cst_27 = arith.constant 1.000000e+00 : f32
    %51 = vector.broadcast %cst_27 : f32 to vector<8x192xf32>
    %52 = arith.addf %51, %50 : vector<8x192xf32>
    %53 = arith.divf %51, %52 : vector<8x192xf32>
    %54 = vector.extract_strided_slice %53 {offsets = [0, 0], sizes = [8, 64], strides = [1, 1]} : vector<8x192xf32> to vector<8x64xf32>
    %55 = vector.extract_strided_slice %53 {offsets = [0, 64], sizes = [8, 64], strides = [1, 1]} : vector<8x192xf32> to vector<8x64xf32>
    %56 = vector.extract_strided_slice %53 {offsets = [0, 128], sizes = [8, 64], strides = [1, 1]} : vector<8x192xf32> to vector<8x64xf32>
    %57 = vector.extract_strided_slice %47 {offsets = [0, 192], sizes = [8, 64], strides = [1, 1]} : vector<8x256xf32> to vector<8x64xf32>
    %58 = math.tanh %57 : vector<8x64xf32>
    %59 = arith.mulf %55, %39 : vector<8x64xf32>
    %60 = arith.mulf %54, %58 : vector<8x64xf32>
    %61 = arith.addf %59, %60 : vector<8x64xf32>
    %62 = math.tanh %61 : vector<8x64xf32>
    %63 = arith.mulf %56, %62 : vector<8x64xf32>
    %c2_i32 = arith.constant 2 : i32
    %c8_i32_28 = arith.constant 8 : i32
    %64 = arith.muli %c2_i32, %c8_i32_28 : i32
    %65 = tpu.assume_multiple %64, 8 : i32
    %66 = arith.index_cast %65 : i32 to index
    %c0_29 = arith.constant 0 : index
    %67 = vector.load %arg10[%66, %c0_29] : memref<96x256xf32, #tpu.memory_space<vmem>>, vector<8x256xf32>
    %cst_30 = arith.constant dense<0.000000e+00> : vector<8x256xf32>
    %68 = tpu.matmul %63, %17, %cst_30 {dimension_numbers = #tpu.dot_dimension_numbers<[1], [0], [0], [1], [0, 0, 1, 1], [], []>} : vector<8x64xf32>, vector<64x256xf32>, vector<8x256xf32> -> vector<8x256xf32>
    %69 = arith.addf %67, %68 : vector<8x256xf32>
    %70 = vector.extract_strided_slice %69 {offsets = [0, 0], sizes = [8, 192], strides = [1, 1]} : vector<8x256xf32> to vector<8x192xf32>
    %71 = arith.negf %70 : vector<8x192xf32>
    %72 = math.exp %71 : vector<8x192xf32>
    %cst_31 = arith.constant 1.000000e+00 : f32
    %73 = vector.broadcast %cst_31 : f32 to vector<8x192xf32>
    %74 = arith.addf %73, %72 : vector<8x192xf32>
    %75 = arith.divf %73, %74 : vector<8x192xf32>
    %76 = vector.extract_strided_slice %75 {offsets = [0, 0], sizes = [8, 64], strides = [1, 1]} : vector<8x192xf32> to vector<8x64xf32>
    %77 = vector.extract_strided_slice %75 {offsets = [0, 64], sizes = [8, 64], strides = [1, 1]} : vector<8x192xf32> to vector<8x64xf32>
    %78 = vector.extract_strided_slice %75 {offsets = [0, 128], sizes = [8, 64], strides = [1, 1]} : vector<8x192xf32> to vector<8x64xf32>
    %79 = vector.extract_strided_slice %69 {offsets = [0, 192], sizes = [8, 64], strides = [1, 1]} : vector<8x256xf32> to vector<8x64xf32>
    %80 = math.tanh %79 : vector<8x64xf32>
    %81 = arith.mulf %77, %61 : vector<8x64xf32>
    %82 = arith.mulf %76, %80 : vector<8x64xf32>
    %83 = arith.addf %81, %82 : vector<8x64xf32>
    %84 = math.tanh %83 : vector<8x64xf32>
    %85 = arith.mulf %78, %84 : vector<8x64xf32>
    %c3_i32 = arith.constant 3 : i32
    %c8_i32_32 = arith.constant 8 : i32
    %86 = arith.muli %c3_i32, %c8_i32_32 : i32
    %87 = tpu.assume_multiple %86, 8 : i32
    %88 = arith.index_cast %87 : i32 to index
    %c0_33 = arith.constant 0 : index
    %89 = vector.load %arg10[%88, %c0_33] : memref<96x256xf32, #tpu.memory_space<vmem>>, vector<8x256xf32>
    %cst_34 = arith.constant dense<0.000000e+00> : vector<8x256xf32>
    %90 = tpu.matmul %85, %17, %cst_34 {dimension_numbers = #tpu.dot_dimension_numbers<[1], [0], [0], [1], [0, 0, 1, 1], [], []>} : vector<8x64xf32>, vector<64x256xf32>, vector<8x256xf32> -> vector<8x256xf32>
    %91 = arith.addf %89, %90 : vector<8x256xf32>
    %92 = vector.extract_strided_slice %91 {offsets = [0, 0], sizes = [8, 192], strides = [1, 1]} : vector<8x256xf32> to vector<8x192xf32>
    %93 = arith.negf %92 : vector<8x192xf32>
    %94 = math.exp %93 : vector<8x192xf32>
    %cst_35 = arith.constant 1.000000e+00 : f32
    %95 = vector.broadcast %cst_35 : f32 to vector<8x192xf32>
    %96 = arith.addf %95, %94 : vector<8x192xf32>
    %97 = arith.divf %95, %96 : vector<8x192xf32>
    %98 = vector.extract_strided_slice %97 {offsets = [0, 0], sizes = [8, 64], strides = [1, 1]} : vector<8x192xf32> to vector<8x64xf32>
    %99 = vector.extract_strided_slice %97 {offsets = [0, 64], sizes = [8, 64], strides = [1, 1]} : vector<8x192xf32> to vector<8x64xf32>
    %100 = vector.extract_strided_slice %97 {offsets = [0, 128], sizes = [8, 64], strides = [1, 1]} : vector<8x192xf32> to vector<8x64xf32>
    %101 = vector.extract_strided_slice %91 {offsets = [0, 192], sizes = [8, 64], strides = [1, 1]} : vector<8x256xf32> to vector<8x64xf32>
    %102 = math.tanh %101 : vector<8x64xf32>
    %103 = arith.mulf %99, %83 : vector<8x64xf32>
    %104 = arith.mulf %98, %102 : vector<8x64xf32>
    %105 = arith.addf %103, %104 : vector<8x64xf32>
    %106 = math.tanh %105 : vector<8x64xf32>
    %107 = arith.mulf %100, %106 : vector<8x64xf32>
    %c4_i32 = arith.constant 4 : i32
    %c8_i32_36 = arith.constant 8 : i32
    %108 = arith.muli %c4_i32, %c8_i32_36 : i32
    %109 = tpu.assume_multiple %108, 8 : i32
    %110 = arith.index_cast %109 : i32 to index
    %c0_37 = arith.constant 0 : index
    %111 = vector.load %arg10[%110, %c0_37] : memref<96x256xf32, #tpu.memory_space<vmem>>, vector<8x256xf32>
    %cst_38 = arith.constant dense<0.000000e+00> : vector<8x256xf32>
    %112 = tpu.matmul %107, %17, %cst_38 {dimension_numbers = #tpu.dot_dimension_numbers<[1], [0], [0], [1], [0, 0, 1, 1], [], []>} : vector<8x64xf32>, vector<64x256xf32>, vector<8x256xf32> -> vector<8x256xf32>
    %113 = arith.addf %111, %112 : vector<8x256xf32>
    %114 = vector.extract_strided_slice %113 {offsets = [0, 0], sizes = [8, 192], strides = [1, 1]} : vector<8x256xf32> to vector<8x192xf32>
    %115 = arith.negf %114 : vector<8x192xf32>
    %116 = math.exp %115 : vector<8x192xf32>
    %cst_39 = arith.constant 1.000000e+00 : f32
    %117 = vector.broadcast %cst_39 : f32 to vector<8x192xf32>
    %118 = arith.addf %117, %116 : vector<8x192xf32>
    %119 = arith.divf %117, %118 : vector<8x192xf32>
    %120 = vector.extract_strided_slice %119 {offsets = [0, 0], sizes = [8, 64], strides = [1, 1]} : vector<8x192xf32> to vector<8x64xf32>
    %121 = vector.extract_strided_slice %119 {offsets = [0, 64], sizes = [8, 64], strides = [1, 1]} : vector<8x192xf32> to vector<8x64xf32>
    %122 = vector.extract_strided_slice %119 {offsets = [0, 128], sizes = [8, 64], strides = [1, 1]} : vector<8x192xf32> to vector<8x64xf32>
    %123 = vector.extract_strided_slice %113 {offsets = [0, 192], sizes = [8, 64], strides = [1, 1]} : vector<8x256xf32> to vector<8x64xf32>
    %124 = math.tanh %123 : vector<8x64xf32>
    %125 = arith.mulf %121, %105 : vector<8x64xf32>
    %126 = arith.mulf %120, %124 : vector<8x64xf32>
    %127 = arith.addf %125, %126 : vector<8x64xf32>
    %128 = math.tanh %127 : vector<8x64xf32>
    %129 = arith.mulf %122, %128 : vector<8x64xf32>
    %c5_i32 = arith.constant 5 : i32
    %c8_i32_40 = arith.constant 8 : i32
    %130 = arith.muli %c5_i32, %c8_i32_40 : i32
    %131 = tpu.assume_multiple %130, 8 : i32
    %132 = arith.index_cast %131 : i32 to index
    %c0_41 = arith.constant 0 : index
    %133 = vector.load %arg10[%132, %c0_41] : memref<96x256xf32, #tpu.memory_space<vmem>>, vector<8x256xf32>
    %cst_42 = arith.constant dense<0.000000e+00> : vector<8x256xf32>
    %134 = tpu.matmul %129, %17, %cst_42 {dimension_numbers = #tpu.dot_dimension_numbers<[1], [0], [0], [1], [0, 0, 1, 1], [], []>} : vector<8x64xf32>, vector<64x256xf32>, vector<8x256xf32> -> vector<8x256xf32>
    %135 = arith.addf %133, %134 : vector<8x256xf32>
    %136 = vector.extract_strided_slice %135 {offsets = [0, 0], sizes = [8, 192], strides = [1, 1]} : vector<8x256xf32> to vector<8x192xf32>
    %137 = arith.negf %136 : vector<8x192xf32>
    %138 = math.exp %137 : vector<8x192xf32>
    %cst_43 = arith.constant 1.000000e+00 : f32
    %139 = vector.broadcast %cst_43 : f32 to vector<8x192xf32>
    %140 = arith.addf %139, %138 : vector<8x192xf32>
    %141 = arith.divf %139, %140 : vector<8x192xf32>
    %142 = vector.extract_strided_slice %141 {offsets = [0, 0], sizes = [8, 64], strides = [1, 1]} : vector<8x192xf32> to vector<8x64xf32>
    %143 = vector.extract_strided_slice %141 {offsets = [0, 64], sizes = [8, 64], strides = [1, 1]} : vector<8x192xf32> to vector<8x64xf32>
    %144 = vector.extract_strided_slice %141 {offsets = [0, 128], sizes = [8, 64], strides = [1, 1]} : vector<8x192xf32> to vector<8x64xf32>
    %145 = vector.extract_strided_slice %135 {offsets = [0, 192], sizes = [8, 64], strides = [1, 1]} : vector<8x256xf32> to vector<8x64xf32>
    %146 = math.tanh %145 : vector<8x64xf32>
    %147 = arith.mulf %143, %127 : vector<8x64xf32>
    %148 = arith.mulf %142, %146 : vector<8x64xf32>
    %149 = arith.addf %147, %148 : vector<8x64xf32>
    %150 = math.tanh %149 : vector<8x64xf32>
    %151 = arith.mulf %144, %150 : vector<8x64xf32>
    %c6_i32 = arith.constant 6 : i32
    %c8_i32_44 = arith.constant 8 : i32
    %152 = arith.muli %c6_i32, %c8_i32_44 : i32
    %153 = tpu.assume_multiple %152, 8 : i32
    %154 = arith.index_cast %153 : i32 to index
    %c0_45 = arith.constant 0 : index
    %155 = vector.load %arg10[%154, %c0_45] : memref<96x256xf32, #tpu.memory_space<vmem>>, vector<8x256xf32>
    %cst_46 = arith.constant dense<0.000000e+00> : vector<8x256xf32>
    %156 = tpu.matmul %151, %17, %cst_46 {dimension_numbers = #tpu.dot_dimension_numbers<[1], [0], [0], [1], [0, 0, 1, 1], [], []>} : vector<8x64xf32>, vector<64x256xf32>, vector<8x256xf32> -> vector<8x256xf32>
    %157 = arith.addf %155, %156 : vector<8x256xf32>
    %158 = vector.extract_strided_slice %157 {offsets = [0, 0], sizes = [8, 192], strides = [1, 1]} : vector<8x256xf32> to vector<8x192xf32>
    %159 = arith.negf %158 : vector<8x192xf32>
    %160 = math.exp %159 : vector<8x192xf32>
    %cst_47 = arith.constant 1.000000e+00 : f32
    %161 = vector.broadcast %cst_47 : f32 to vector<8x192xf32>
    %162 = arith.addf %161, %160 : vector<8x192xf32>
    %163 = arith.divf %161, %162 : vector<8x192xf32>
    %164 = vector.extract_strided_slice %163 {offsets = [0, 0], sizes = [8, 64], strides = [1, 1]} : vector<8x192xf32> to vector<8x64xf32>
    %165 = vector.extract_strided_slice %163 {offsets = [0, 64], sizes = [8, 64], strides = [1, 1]} : vector<8x192xf32> to vector<8x64xf32>
    %166 = vector.extract_strided_slice %163 {offsets = [0, 128], sizes = [8, 64], strides = [1, 1]} : vector<8x192xf32> to vector<8x64xf32>
    %167 = vector.extract_strided_slice %157 {offsets = [0, 192], sizes = [8, 64], strides = [1, 1]} : vector<8x256xf32> to vector<8x64xf32>
    %168 = math.tanh %167 : vector<8x64xf32>
    %169 = arith.mulf %165, %149 : vector<8x64xf32>
    %170 = arith.mulf %164, %168 : vector<8x64xf32>
    %171 = arith.addf %169, %170 : vector<8x64xf32>
    %172 = math.tanh %171 : vector<8x64xf32>
    %173 = arith.mulf %166, %172 : vector<8x64xf32>
    %c7_i32 = arith.constant 7 : i32
    %c8_i32_48 = arith.constant 8 : i32
    %174 = arith.muli %c7_i32, %c8_i32_48 : i32
    %175 = tpu.assume_multiple %174, 8 : i32
    %176 = arith.index_cast %175 : i32 to index
    %c0_49 = arith.constant 0 : index
    %177 = vector.load %arg10[%176, %c0_49] : memref<96x256xf32, #tpu.memory_space<vmem>>, vector<8x256xf32>
    %cst_50 = arith.constant dense<0.000000e+00> : vector<8x256xf32>
    %178 = tpu.matmul %173, %17, %cst_50 {dimension_numbers = #tpu.dot_dimension_numbers<[1], [0], [0], [1], [0, 0, 1, 1], [], []>} : vector<8x64xf32>, vector<64x256xf32>, vector<8x256xf32> -> vector<8x256xf32>
    %179 = arith.addf %177, %178 : vector<8x256xf32>
    %180 = vector.extract_strided_slice %179 {offsets = [0, 0], sizes = [8, 192], strides = [1, 1]} : vector<8x256xf32> to vector<8x192xf32>
    %181 = arith.negf %180 : vector<8x192xf32>
    %182 = math.exp %181 : vector<8x192xf32>
    %cst_51 = arith.constant 1.000000e+00 : f32
    %183 = vector.broadcast %cst_51 : f32 to vector<8x192xf32>
    %184 = arith.addf %183, %182 : vector<8x192xf32>
    %185 = arith.divf %183, %184 : vector<8x192xf32>
    %186 = vector.extract_strided_slice %185 {offsets = [0, 0], sizes = [8, 64], strides = [1, 1]} : vector<8x192xf32> to vector<8x64xf32>
    %187 = vector.extract_strided_slice %185 {offsets = [0, 64], sizes = [8, 64], strides = [1, 1]} : vector<8x192xf32> to vector<8x64xf32>
    %188 = vector.extract_strided_slice %185 {offsets = [0, 128], sizes = [8, 64], strides = [1, 1]} : vector<8x192xf32> to vector<8x64xf32>
    %189 = vector.extract_strided_slice %179 {offsets = [0, 192], sizes = [8, 64], strides = [1, 1]} : vector<8x256xf32> to vector<8x64xf32>
    %190 = math.tanh %189 : vector<8x64xf32>
    %191 = arith.mulf %187, %171 : vector<8x64xf32>
    %192 = arith.mulf %186, %190 : vector<8x64xf32>
    %193 = arith.addf %191, %192 : vector<8x64xf32>
    %194 = math.tanh %193 : vector<8x64xf32>
    %195 = arith.mulf %188, %194 : vector<8x64xf32>
    %c8_i32_52 = arith.constant 8 : i32
    %c8_i32_53 = arith.constant 8 : i32
    %196 = arith.muli %c8_i32_52, %c8_i32_53 : i32
    %197 = tpu.assume_multiple %196, 8 : i32
    %198 = arith.index_cast %197 : i32 to index
    %c0_54 = arith.constant 0 : index
    %199 = vector.load %arg10[%198, %c0_54] : memref<96x256xf32, #tpu.memory_space<vmem>>, vector<8x256xf32>
    %cst_55 = arith.constant dense<0.000000e+00> : vector<8x256xf32>
    %200 = tpu.matmul %195, %17, %cst_55 {dimension_numbers = #tpu.dot_dimension_numbers<[1], [0], [0], [1], [0, 0, 1, 1], [], []>} : vector<8x64xf32>, vector<64x256xf32>, vector<8x256xf32> -> vector<8x256xf32>
    %201 = arith.addf %199, %200 : vector<8x256xf32>
    %202 = vector.extract_strided_slice %201 {offsets = [0, 0], sizes = [8, 192], strides = [1, 1]} : vector<8x256xf32> to vector<8x192xf32>
    %203 = arith.negf %202 : vector<8x192xf32>
    %204 = math.exp %203 : vector<8x192xf32>
    %cst_56 = arith.constant 1.000000e+00 : f32
    %205 = vector.broadcast %cst_56 : f32 to vector<8x192xf32>
    %206 = arith.addf %205, %204 : vector<8x192xf32>
    %207 = arith.divf %205, %206 : vector<8x192xf32>
    %208 = vector.extract_strided_slice %207 {offsets = [0, 0], sizes = [8, 64], strides = [1, 1]} : vector<8x192xf32> to vector<8x64xf32>
    %209 = vector.extract_strided_slice %207 {offsets = [0, 64], sizes = [8, 64], strides = [1, 1]} : vector<8x192xf32> to vector<8x64xf32>
    %210 = vector.extract_strided_slice %207 {offsets = [0, 128], sizes = [8, 64], strides = [1, 1]} : vector<8x192xf32> to vector<8x64xf32>
    %211 = vector.extract_strided_slice %201 {offsets = [0, 192], sizes = [8, 64], strides = [1, 1]} : vector<8x256xf32> to vector<8x64xf32>
    %212 = math.tanh %211 : vector<8x64xf32>
    %213 = arith.mulf %209, %193 : vector<8x64xf32>
    %214 = arith.mulf %208, %212 : vector<8x64xf32>
    %215 = arith.addf %213, %214 : vector<8x64xf32>
    %216 = math.tanh %215 : vector<8x64xf32>
    %217 = arith.mulf %210, %216 : vector<8x64xf32>
    %c9_i32 = arith.constant 9 : i32
    %c8_i32_57 = arith.constant 8 : i32
    %218 = arith.muli %c9_i32, %c8_i32_57 : i32
    %219 = tpu.assume_multiple %218, 8 : i32
    %220 = arith.index_cast %219 : i32 to index
    %c0_58 = arith.constant 0 : index
    %221 = vector.load %arg10[%220, %c0_58] : memref<96x256xf32, #tpu.memory_space<vmem>>, vector<8x256xf32>
    %cst_59 = arith.constant dense<0.000000e+00> : vector<8x256xf32>
    %222 = tpu.matmul %217, %17, %cst_59 {dimension_numbers = #tpu.dot_dimension_numbers<[1], [0], [0], [1], [0, 0, 1, 1], [], []>} : vector<8x64xf32>, vector<64x256xf32>, vector<8x256xf32> -> vector<8x256xf32>
    %223 = arith.addf %221, %222 : vector<8x256xf32>
    %224 = vector.extract_strided_slice %223 {offsets = [0, 0], sizes = [8, 192], strides = [1, 1]} : vector<8x256xf32> to vector<8x192xf32>
    %225 = arith.negf %224 : vector<8x192xf32>
    %226 = math.exp %225 : vector<8x192xf32>
    %cst_60 = arith.constant 1.000000e+00 : f32
    %227 = vector.broadcast %cst_60 : f32 to vector<8x192xf32>
    %228 = arith.addf %227, %226 : vector<8x192xf32>
    %229 = arith.divf %227, %228 : vector<8x192xf32>
    %230 = vector.extract_strided_slice %229 {offsets = [0, 0], sizes = [8, 64], strides = [1, 1]} : vector<8x192xf32> to vector<8x64xf32>
    %231 = vector.extract_strided_slice %229 {offsets = [0, 64], sizes = [8, 64], strides = [1, 1]} : vector<8x192xf32> to vector<8x64xf32>
    %232 = vector.extract_strided_slice %229 {offsets = [0, 128], sizes = [8, 64], strides = [1, 1]} : vector<8x192xf32> to vector<8x64xf32>
    %233 = vector.extract_strided_slice %223 {offsets = [0, 192], sizes = [8, 64], strides = [1, 1]} : vector<8x256xf32> to vector<8x64xf32>
    %234 = math.tanh %233 : vector<8x64xf32>
    %235 = arith.mulf %231, %215 : vector<8x64xf32>
    %236 = arith.mulf %230, %234 : vector<8x64xf32>
    %237 = arith.addf %235, %236 : vector<8x64xf32>
    %238 = math.tanh %237 : vector<8x64xf32>
    %239 = arith.mulf %232, %238 : vector<8x64xf32>
    %c10_i32 = arith.constant 10 : i32
    %c8_i32_61 = arith.constant 8 : i32
    %240 = arith.muli %c10_i32, %c8_i32_61 : i32
    %241 = tpu.assume_multiple %240, 8 : i32
    %242 = arith.index_cast %241 : i32 to index
    %c0_62 = arith.constant 0 : index
    %243 = vector.load %arg10[%242, %c0_62] : memref<96x256xf32, #tpu.memory_space<vmem>>, vector<8x256xf32>
    %cst_63 = arith.constant dense<0.000000e+00> : vector<8x256xf32>
    %244 = tpu.matmul %239, %17, %cst_63 {dimension_numbers = #tpu.dot_dimension_numbers<[1], [0], [0], [1], [0, 0, 1, 1], [], []>} : vector<8x64xf32>, vector<64x256xf32>, vector<8x256xf32> -> vector<8x256xf32>
    %245 = arith.addf %243, %244 : vector<8x256xf32>
    %246 = vector.extract_strided_slice %245 {offsets = [0, 0], sizes = [8, 192], strides = [1, 1]} : vector<8x256xf32> to vector<8x192xf32>
    %247 = arith.negf %246 : vector<8x192xf32>
    %248 = math.exp %247 : vector<8x192xf32>
    %cst_64 = arith.constant 1.000000e+00 : f32
    %249 = vector.broadcast %cst_64 : f32 to vector<8x192xf32>
    %250 = arith.addf %249, %248 : vector<8x192xf32>
    %251 = arith.divf %249, %250 : vector<8x192xf32>
    %252 = vector.extract_strided_slice %251 {offsets = [0, 0], sizes = [8, 64], strides = [1, 1]} : vector<8x192xf32> to vector<8x64xf32>
    %253 = vector.extract_strided_slice %251 {offsets = [0, 64], sizes = [8, 64], strides = [1, 1]} : vector<8x192xf32> to vector<8x64xf32>
    %254 = vector.extract_strided_slice %251 {offsets = [0, 128], sizes = [8, 64], strides = [1, 1]} : vector<8x192xf32> to vector<8x64xf32>
    %255 = vector.extract_strided_slice %245 {offsets = [0, 192], sizes = [8, 64], strides = [1, 1]} : vector<8x256xf32> to vector<8x64xf32>
    %256 = math.tanh %255 : vector<8x64xf32>
    %257 = arith.mulf %253, %237 : vector<8x64xf32>
    %258 = arith.mulf %252, %256 : vector<8x64xf32>
    %259 = arith.addf %257, %258 : vector<8x64xf32>
    %260 = math.tanh %259 : vector<8x64xf32>
    %261 = arith.mulf %254, %260 : vector<8x64xf32>
    %c11_i32 = arith.constant 11 : i32
    %c8_i32_65 = arith.constant 8 : i32
    %262 = arith.muli %c11_i32, %c8_i32_65 : i32
    %263 = tpu.assume_multiple %262, 8 : i32
    %264 = arith.index_cast %263 : i32 to index
    %c0_66 = arith.constant 0 : index
    %265 = vector.load %arg10[%264, %c0_66] : memref<96x256xf32, #tpu.memory_space<vmem>>, vector<8x256xf32>
    %cst_67 = arith.constant dense<0.000000e+00> : vector<8x256xf32>
    %266 = tpu.matmul %261, %17, %cst_67 {dimension_numbers = #tpu.dot_dimension_numbers<[1], [0], [0], [1], [0, 0, 1, 1], [], []>} : vector<8x64xf32>, vector<64x256xf32>, vector<8x256xf32> -> vector<8x256xf32>
    %267 = arith.addf %265, %266 : vector<8x256xf32>
    %268 = vector.extract_strided_slice %267 {offsets = [0, 0], sizes = [8, 192], strides = [1, 1]} : vector<8x256xf32> to vector<8x192xf32>
    %269 = arith.negf %268 : vector<8x192xf32>
    %270 = math.exp %269 : vector<8x192xf32>
    %cst_68 = arith.constant 1.000000e+00 : f32
    %271 = vector.broadcast %cst_68 : f32 to vector<8x192xf32>
    %272 = arith.addf %271, %270 : vector<8x192xf32>
    %273 = arith.divf %271, %272 : vector<8x192xf32>
    %274 = vector.extract_strided_slice %273 {offsets = [0, 0], sizes = [8, 64], strides = [1, 1]} : vector<8x192xf32> to vector<8x64xf32>
    %275 = vector.extract_strided_slice %273 {offsets = [0, 64], sizes = [8, 64], strides = [1, 1]} : vector<8x192xf32> to vector<8x64xf32>
    %276 = vector.extract_strided_slice %273 {offsets = [0, 128], sizes = [8, 64], strides = [1, 1]} : vector<8x192xf32> to vector<8x64xf32>
    %277 = vector.extract_strided_slice %267 {offsets = [0, 192], sizes = [8, 64], strides = [1, 1]} : vector<8x256xf32> to vector<8x64xf32>
    %278 = math.tanh %277 : vector<8x64xf32>
    %279 = arith.mulf %275, %259 : vector<8x64xf32>
    %280 = arith.mulf %274, %278 : vector<8x64xf32>
    %281 = arith.addf %279, %280 : vector<8x64xf32>
    %282 = math.tanh %281 : vector<8x64xf32>
    %283 = arith.mulf %276, %282 : vector<8x64xf32>
    %c12_i32 = arith.constant 12 : i32
    %c0_69 = arith.constant 0 : index
    %c0_70 = arith.constant 0 : index
    %284 = vector.load %arg11[%c0_69, %c0_70] : memref<8x64xf32, #tpu.memory_space<vmem>>, vector<8x64xf32>
    tpu.vector_store %arg11[%c0_69, %c0_70], %283 {strides = array<i32>} : memref<8x64xf32, #tpu.memory_space<vmem>>, vector<8x64xf32>,
    %c0_71 = arith.constant 0 : index
    %c0_72 = arith.constant 0 : index
    %285 = vector.load %arg12[%c0_71, %c0_72] : memref<8x64xf32, #tpu.memory_space<vmem>>, vector<8x64xf32>
    tpu.vector_store %arg12[%c0_71, %c0_72], %281 {strides = array<i32>} : memref<8x64xf32, #tpu.memory_space<vmem>>, vector<8x64xf32>,
    %c0_i32_73 = arith.constant 0 : i32
    %286 = arith.cmpi eq, %arg0, %c0_i32_73 : i32
    %287 = arith.extui %286 : i1 to i32
    %c0_i32_74 = arith.constant 0 : i32
    %288 = arith.cmpi ne, %287, %c0_i32_74 : i32
    scf.if %288 {
      %cst_75 = arith.constant 0.000000e+00 : f32
      %289 = vector.broadcast %cst_75 : f32 to vector<8x64xf32>
      %290 = arith.maximumf %283, %289 : vector<8x64xf32>
      %c0_76 = arith.constant 0 : index
      %c0_77 = arith.constant 0 : index
      %291 = vector.load %arg7[%c0_76, %c0_77] : memref<64x128xf32, #tpu.memory_space<vmem>>, vector<64x128xf32>
      %cst_78 = arith.constant dense<0.000000e+00> : vector<8x128xf32>
      %292 = tpu.matmul %290, %291, %cst_78 {dimension_numbers = #tpu.dot_dimension_numbers<[1], [0], [0], [1], [0, 0, 1, 1], [], []>} : vector<8x64xf32>, vector<64x128xf32>, vector<8x128xf32> -> vector<8x128xf32>
      %c0_79 = arith.constant 0 : index
      %c0_80 = arith.constant 0 : index
      %293 = vector.load %arg8[%c0_79, %c0_80] : memref<1x128xf32, #tpu.memory_space<vmem>>, vector<1x128xf32>
      %294 = vector.broadcast %293 : vector<1x128xf32> to vector<8x128xf32>
      %295 = arith.addf %292, %294 : vector<8x128xf32>
      %c0_81 = arith.constant 0 : index
      %c0_82 = arith.constant 0 : index
      %296 = vector.load %arg9[%c0_81, %c0_82] : memref<8x128xf32, #tpu.memory_space<vmem>>, vector<8x128xf32>
      tpu.vector_store %arg9[%c0_81, %c0_82], %295 {strides = array<i32>} : memref<8x128xf32, #tpu.memory_space<vmem>>, vector<8x128xf32>,
    } else {
    }
    return
  }
  func.func @transform_0(%arg0: i32) -> (i32, i32) {
    %c0_i32 = arith.constant 0 : i32
    %c0_i32_0 = arith.constant 0 : i32
    return %arg0, %c0_i32 : i32, i32
  }
  func.func @transform_1(%arg0: i32) -> (i32, i32) {
    %c0_i32 = arith.constant 0 : i32
    %c0_i32_0 = arith.constant 0 : i32
    %c0_i32_1 = arith.constant 0 : i32
    return %c0_i32, %c0_i32_0 : i32, i32
  }
  func.func @transform_2(%arg0: i32) -> (i32, i32) {
    %c0_i32 = arith.constant 0 : i32
    %c0_i32_0 = arith.constant 0 : i32
    %c0_i32_1 = arith.constant 0 : i32
    return %c0_i32, %c0_i32_0 : i32, i32
  }
  func.func @transform_3(%arg0: i32) -> (i32, i32) {
    %c0_i32 = arith.constant 0 : i32
    %c0_i32_0 = arith.constant 0 : i32
    %c0_i32_1 = arith.constant 0 : i32
    return %c0_i32, %c0_i32_0 : i32, i32
  }
  func.func @transform_4(%arg0: i32) -> (i32, i32) {
    %c0_i32 = arith.constant 0 : i32
    %c0_i32_0 = arith.constant 0 : i32
    %c0_i32_1 = arith.constant 0 : i32
    return %c0_i32, %c0_i32_0 : i32, i32
  }
  func.func @transform_5(%arg0: i32) -> (i32, i32) {
    %c0_i32 = arith.constant 0 : i32
    %c0_i32_0 = arith.constant 0 : i32
    %c0_i32_1 = arith.constant 0 : i32
    return %c0_i32, %c0_i32_0 : i32, i32
  }
  func.func @transform_6(%arg0: i32) -> (i32, i32) {
    %c0_i32 = arith.constant 0 : i32
    %c0_i32_0 = arith.constant 0 : i32
    %c0_i32_1 = arith.constant 0 : i32
    return %c0_i32, %c0_i32_0 : i32, i32
  }
  func.func @transform_7(%arg0: i32) -> (i32, i32) {
    %c0_i32 = arith.constant 0 : i32
    %c0_i32_0 = arith.constant 0 : i32
    %c0_i32_1 = arith.constant 0 : i32
    return %c0_i32, %c0_i32_0 : i32, i32
  }
  func.func @transform_8(%arg0: i32) -> (i32, i32) {
    %c0_i32 = arith.constant 0 : i32
    %c0_i32_0 = arith.constant 0 : i32
    %c0_i32_1 = arith.constant 0 : i32
    return %c0_i32, %c0_i32_0 : i32, i32
  }
}

</mosaic_0001>

<bundles_post_ra>
// kernel: critic_network_forward.1
= control target key start
LH: loop header
LB: loop body
LE: loop exit
PB: predicated region body
PF: predicated region fallthrough
CT: control target
= control target key end

     0   :  { %vm59_vm0 = vcmask 261120   ;;  %vm33_vm1 = vcmask 523264   ;;  %v2484_v42 = vmov 0.0   ;;  %s2485_s29 = smov 64   ;;  %vm2487_vm2 = vmmov 0   ;;  %s3027_s1 = inlined_call_operand.vmem [shape: f32[32,64], index: 1, kind: input, shape index: {}]   ;;  %s3028_s0 = inlined_call_operand.vmem [shape: f32[96,32], index: 0, kind: input, shape index: {}]   ;;  %s3029_s3 = inlined_call_operand.vmem [shape: f32[64,256], index: 3, kind: input, shape index: {}]   ;;  %s3030_s5 = inlined_call_operand.vmem [shape: f32[64,256], index: 5, kind: input, shape index: {}]   ;;  %s3031_s2 = inlined_call_operand.vmem [shape: f32[1,64], index: 2, kind: input, shape index: {}]   ;;  %s3032_s4 = inlined_call_operand.vmem [shape: f32[1,256], index: 4, kind: input, shape index: {}]   ;;  %s3033_s6 = inlined_call_operand.vmem [shape: f32[64,128], index: 6, kind: input, shape index: {}]   ;;  %s3034_s7 = inlined_call_operand.vmem [shape: f32[1,128], index: 7, kind: input, shape index: {}]   ;;  %s3035_s8 = inlined_call_operand.vmem [shape: f32[8,128], index: 8, kind: output, shape index: {}]  }
   0x1   :  { %v48_v0 = vld [vmem:[%s3027_s1] sm:$0xff]  ;;  %v49_v1 = vld [vmem:[%s3027_s1 + $0x8] sm:$0xff]  ;;  %v50_v2 = vld [vmem:[%s3027_s1 + $0x10] sm:$0xff]  ;;  %34 = vst.msk [vmem:[#allocation3] sm:$0xff] %vm33_vm1, %v2484_v42  ;;  %886 = vmatprep.mubr.f32.mxu1 %v2484_v42 }
   0x2   :  { %v2060_v3 = vpack.c.bf16 %v49_v1, %v48_v0  ;;  %v51_v4 = vld [vmem:[%s3027_s1 + $0x18] sm:$0xff]  ;;  %v36_v5 = vld [vmem:[%s3028_s0] sm:$0xff]  ;;  %v234_v7 = vld [vmem:[%s3029_s3 + $0x8] sm:$0xff]  ;;  %35 = vst.msk [vmem:[#allocation4] sm:$0xff] %vm33_vm1, %v2484_v42 }
   0x3   :  { %v2064_v6 = vpack.c.bf16 %v51_v4, %v50_v2  ;;  %2023 = vmatprep.mubr.msk.f32.mxu0 %vm59_vm0, %v36_v5  ;;  %v236_v8 = vld [vmem:[%s3029_s3 + $0x18] sm:$0xff]  ;;  %v233_v10 = vld [vmem:[%s3029_s3] sm:$0xff]  ;;  %v235_v11 = vld [vmem:[%s3029_s3 + $0x10] sm:$0xff] }
   0x4   :  { %2061 = vmatprep.subr.bf16.mxu0 %v2060_v3  ;;  %v2068_v9 = vpack.c.bf16 %v236_v8, %v234_v7  ;;  %v238_v12 = vld [vmem:[%s3029_s3 + $0x28] sm:$0xff]  ;;  %v240_v13 = vld [vmem:[%s3029_s3 + $0x38] sm:$0xff]  ;;  %v2070_v15 = vpack.c.bf16 %v235_v11, %v233_v10  ;;  %v38_v16 = vld [vmem:[%s3028_s0 + $0x10] sm:$0xff] }
   0x5   :  { %2063 = vmatpush3.bf16.msra.mxu0 %v2060_v3  ;;  %v37_v14 = vld [vmem:[%s3028_s0 + $0x8] sm:$0xff]  ;;  %v2072_v17 = vpack.c.bf16 %v240_v13, %v238_v12  ;;  %v237_v18 = vld [vmem:[%s3029_s3 + $0x20] sm:$0xff]  ;;  %v239_v19 = vld [vmem:[%s3029_s3 + $0x30] sm:$0xff] }
   0x6   :  { %2065 = vmatprep.subr.bf16.mxu0 %v2064_v6  ;;  %v242_v20 = vld [vmem:[%s3029_s3 + $0x48] sm:$0xff]  ;;  %v244_v21 = vld [vmem:[%s3029_s3 + $0x58] sm:$0xff]  ;;  %v2074_v23 = vpack.c.bf16 %v239_v19, %v237_v18  ;;  %v40_v24 = vld [vmem:[%s3028_s0 + $0x20] sm:$0xff] }
   0x7   :  { %v39_v22 = vld [vmem:[%s3028_s0 + $0x18] sm:$0xff]  ;;  %v2076_v25 = vpack.c.bf16 %v244_v21, %v242_v20  ;;  %v241_v26 = vld [vmem:[%s3029_s3 + $0x40] sm:$0xff]  ;;  %v243_v27 = vld [vmem:[%s3029_s3 + $0x50] sm:$0xff] }
   0x8   :  { %v246_v28 = vld [vmem:[%s3029_s3 + $0x68] sm:$0xff]  ;;  %v248_v29 = vld [vmem:[%s3029_s3 + $0x78] sm:$0xff]  ;;  %v2078_v31 = vpack.c.bf16 %v243_v27, %v241_v26  ;;  %v42_v32 = vld [vmem:[%s3028_s0 + $0x30] sm:$0xff] }
   0x9   :  { %2067 = vmatpush3.bf16.msra.mxu0 %v2064_v6  ;;  %v41_v30 = vld [vmem:[%s3028_s0 + $0x28] sm:$0xff]  ;;  %v2080_v33 = vpack.c.bf16 %v248_v29, %v246_v28  ;;  %v43_v34 = vld [vmem:[%s3028_s0 + $0x38] sm:$0xff]  ;;  %v44_v35 = vld [vmem:[%s3028_s0 + $0x40] sm:$0xff] }
   0xa   :  { %2069 = vmatprep.subr.bf16.mxu0 %v2068_v9  ;;  %v45_v36 = vld [vmem:[%s3028_s0 + $0x48] sm:$0xff]  ;;  %v46_v37 = vld [vmem:[%s3028_s0 + $0x50] sm:$0xff]  ;;  %v47_v38 = vld [vmem:[%s3028_s0 + $0x58] sm:$0xff] }
   0xb   :  { %v245_v39 = vld [vmem:[%s3029_s3 + $0x60] sm:$0xff]  ;;  %v247_v40 = vld [vmem:[%s3029_s3 + $0x70] sm:$0xff]  ;;  %v460_v43 = vld [vmem:[%s3030_s5 + $0x8] sm:$0xff] }
   0xc   :  { %2024 = vmatmul.mubr.msk.f32.vlgmr.msra.gmra.mrb[0].mxu0 %vm59_vm0, %v37_v14  ;;  %v2082_v41 = vpack.c.bf16 %v247_v40, %v245_v39  ;;  %v462_v44 = vld [vmem:[%s3030_s5 + $0x18] sm:$0xff]  ;;  %v459_v46 = vld [vmem:[%s3030_s5] sm:$0xff]  ;;  %v461_v47 = vld [vmem:[%s3030_s5 + $0x10] sm:$0xff] }
   0xd   :  { %2026 = vmatprep.mubr.msk.f32.mxu0 %vm59_vm0, %v38_v16  ;;  %2071 = vmatpush1.bf16.msra.mxu0 %v2070_v15  ;;  %v2653_v45 = vpack.c.bf16 %v462_v44, %v460_v43  ;;  %v2661_v48 = vpack.c.bf16 %v461_v47, %v459_v46  ;;  %v464_v49 = vld [vmem:[%s3030_s5 + $0x28] sm:$0xff]  ;;  %v466_v50 = vld [vmem:[%s3030_s5 + $0x38] sm:$0xff]  ;;  %v463_v52 = vld [vmem:[%s3030_s5 + $0x20] sm:$0xff] }
   0xe   :  { %2073 = vmatprep.subr.bf16.mxu0 %v2072_v17  ;;  %v2672_v51 = vpack.c.bf16 %v466_v50, %v464_v49  ;;  %v465_v53 = vld [vmem:[%s3030_s5 + $0x30] sm:$0xff]  ;;  %v468_v55 = vld [vmem:[%s3030_s5 + $0x48] sm:$0xff]  ;;  %v470_v56 = vld [vmem:[%s3030_s5 + $0x58] sm:$0xff] }
   0xf   :  { %2133 = vmatprep.subr.bf16.mxu1 %v2653_v45  ;;  %v2681_v54 = vpack.c.bf16 %v465_v53, %v463_v52  ;;  %v2690_v57 = vpack.c.bf16 %v470_v56, %v468_v55  ;;  %v467_v58 = vld [vmem:[%s3030_s5 + $0x40] sm:$0xff]  ;;  %v469_v59 = vld [vmem:[%s3030_s5 + $0x50] sm:$0xff]  ;;  %v472_v61 = vld [vmem:[%s3030_s5 + $0x68] sm:$0xff] }
  0x10   :  { %2027 = vmatmul.mubr.msk.f32.gmra.mrb[2].mxu0 %vm59_vm0, %v39_v22  ;;  %2135 = vmatpush1.bf16.msra.mxu1 %v2661_v48  ;;  %v2699_v60 = vpack.c.bf16 %v469_v59, %v467_v58  ;;  %v474_v62 = vld [vmem:[%s3030_s5 + $0x78] sm:$0xff]  ;;  %v471_v0 = vld [vmem:[%s3030_s5 + $0x60] sm:$0xff]  ;;  %v473_v1 = vld [vmem:[%s3030_s5 + $0x70] sm:$0xff]  ;;  %v251_v59 = vlaneseq }
  0x11   :  { %2029 = vmatprep.mubr.msk.f32.mxu0 %vm59_vm0, %v40_v24  ;;  %2075 = vmatpush1.bf16.msra.mxu0 %v2074_v23  ;;  %v2708_v63 = vpack.c.bf16 %v474_v62, %v472_v61  ;;  %v2717_v2 = vpack.c.bf16 %v473_v1, %v471_v0  ;;  %v2724_v3 = vld [vmem:[%s3031_s2] ss:$0 sm:$0xff] }
  0x12   :  { %2077 = vmatprep.subr.bf16.mxu0 %v2076_v25  ;;  %2137 = vmatprep.subr.bf16.mxu1 %v2672_v51  ;;  %v475_v40 = vld [vmem:[#allocation3] sm:$0xff]  ;;  %v252_v0 = vshrl.u32 %v251_v59, 7 }
  0x14   :  { %2030 = vmatmul.mubr.msk.f32.gmra.mrb[4].mxu0 %vm59_vm0, %v41_v30  ;;  %2139 = vmatpush1.bf16.msra.mxu1 %v2681_v54 }
  0x15   :  { %2032 = vmatprep.mubr.msk.f32.mxu0 %vm59_vm0, %v42_v32  ;;  %2079 = vmatpush1.bf16.msra.mxu0 %v2078_v31 }
  0x16   :  { %2081 = vmatprep.subr.bf16.mxu0 %v2080_v33  ;;  %2141 = vmatprep.subr.bf16.mxu1 %v2690_v57 }
  0x18   :  { %2033 = vmatmul.mubr.msk.f32.gmra.mrb[6].mxu0 %vm59_vm0, %v43_v34  ;;  %2143 = vmatpush1.bf16.msra.mxu1 %v2699_v60 }
  0x19   :  { %2035 = vmatprep.mubr.msk.f32.mxu0 %vm59_vm0, %v44_v35  ;;  %2083 = vmatpush1.bf16.msra.mxu0 %v2082_v41 }
  0x1a   :  { %2085 = vmatprep.subr.bf16.mxu0 %v2653_v45  ;;  %2145 = vmatprep.subr.bf16.mxu1 %v2708_v63 }
  0x1c   :  { %2036 = vmatmul.mubr.msk.f32.gmra.mrb[8].mxu0 %vm59_vm0, %v45_v36  ;;  %2147 = vmatpush1.bf16.msra.mxu1 %v2717_v2 }
  0x1d   :  { %2038 = vmatprep.mubr.msk.f32.mxu0 %vm59_vm0, %v46_v37  ;;  %2149 = vmatprep.subr.bf16.mxu1 %v2653_v45 }
  0x20   :  { %2039 = vmatmul.mubr.msk.f32.gmra.mrb[10].mxu0 %vm59_vm0, %v47_v38 }
  0x21   :  { %362 = vmatprep.mubr.f32.mxu0 %v2484_v42 }
  0xdf   :  { %v2025_v4 = vpop.f32.mrb[0].mxu0 }
  0xe0   :  { %v162_v5 = vpop.f32.mrb[1].mxu0  ;;  %v168_v7 = vadd.f32 %v2025_v4, %v2724_v3  ;;  %v257_v4 = vsub.s32 1, %v252_v0 }
  0xe1   :  { %v163_v6 = vadd.f32 %v2724_v3, %v162_v5 }
  0xe2   :  { %v222_v12 = vmax.f32 %v168_v7, 0.0 }
  0xe3   :  { %v221_v8 = vmax.f32 %v163_v6, 0.0  ;;  %v2028_v9 = vpop.f32.mrb[2].mxu0  ;;  %v249_v6 = vld [vmem:[%s3032_s4] sm:$0x3] }
  0xe4   :  { %v172_v10 = vpop.f32.mrb[3].mxu0  ;;  %v178_v16 = vadd.f32 %v2028_v9, %v2724_v3 }
  0xe5   :  { %1940 = vmatmul.mubr.msk.f32.vlgmr.msra.gmra.mrb[12].mxu0 %vm33_vm1, %v221_v8  ;;  %v173_v11 = vadd.f32 %v2724_v3, %v172_v10  ;;  %v2819_v8 = vrot.slane %v249_v6, %v257_v4 }
  0xe6   :  { %2087 = vmatpush1.bf16.msra.mxu0 %v2661_v48  ;;  %368 = vmatprep.mubr.f32.mxu0 %v2484_v42  ;;  %v224_v20 = vmax.f32 %v178_v16, 0.0 }
  0xe7   :  { %v2031_v13 = vpop.f32.mrb[4].mxu0  ;;  %2089 = vmatprep.subr.bf16.mxu0 %v2672_v51  ;;  %v223_v15 = vmax.f32 %v173_v11, 0.0 }
  0xe8   :  { %v182_v14 = vpop.f32.mrb[5].mxu0  ;;  %v188_v24 = vadd.f32 %v2031_v13, %v2724_v3  ;;  %v476_v13 = vld [vmem:[#allocation4] sm:$0xff] }
  0xe9   :  { %1941 = vmatmul.mubr.msk.f32.gmra.mrb[14].mxu0 %vm33_vm1, %v222_v12  ;;  %v183_v19 = vadd.f32 %v2724_v3, %v182_v14  ;;  %v253_v14 = vsub.s32 0, %v252_v0 }
  0xea   :  { %374 = vmatprep.mubr.f32.mxu0 %v2484_v42  ;;  %2091 = vmatpush1.bf16.msra.mxu0 %v2681_v54  ;;  %v226_v28 = vmax.f32 %v188_v24, 0.0 }
  0xeb   :  { %v2034_v17 = vpop.f32.mrb[6].mxu0  ;;  %2093 = vmatprep.subr.bf16.mxu0 %v2690_v57  ;;  %v225_v23 = vmax.f32 %v183_v19, 0.0 }
  0xec   :  { %v192_v18 = vpop.f32.mrb[7].mxu0  ;;  %v198_v30 = vadd.f32 %v2034_v17, %v2724_v3 }
  0xed   :  { %1942 = vmatmul.mubr.msk.f32.gmra.mrb[16].mxu0 %vm33_vm1, %v223_v15  ;;  %v193_v27 = vadd.f32 %v2724_v3, %v192_v18  ;;  %v2824_v15 = vrot.slane %v249_v6, %v253_v14 }
  0xee   :  { %380 = vmatprep.mubr.f32.mxu0 %v2484_v42  ;;  %2095 = vmatpush1.bf16.msra.mxu0 %v2699_v60  ;;  %v228_v32 = vmax.f32 %v198_v30, 0.0 }
  0xef   :  { %v2037_v21 = vpop.f32.mrb[8].mxu0  ;;  %2097 = vmatprep.subr.bf16.mxu0 %v2708_v63  ;;  %v227_v29 = vmax.f32 %v193_v27, 0.0 }
  0xf0   :  { %v202_v22 = vpop.f32.mrb[9].mxu0  ;;  %v208_v34 = vadd.f32 %v2037_v21, %v2724_v3 }
  0xf1   :  { %1943 = vmatmul.mubr.msk.f32.gmra.mrb[18].mxu0 %vm33_vm1, %v224_v20  ;;  %v203_v31 = vadd.f32 %v2724_v3, %v202_v22 }
  0xf2   :  { %386 = vmatprep.mubr.f32.mxu0 %v2484_v42  ;;  %2099 = vmatpush1.bf16.msra.mxu0 %v2717_v2  ;;  %v230_v36 = vmax.f32 %v208_v34, 0.0 }
  0xf3   :  { %v2040_v25 = vpop.f32.mrb[10].mxu0  ;;  %2101 = vmatprep.subr.bf16.mxu0 %v2653_v45  ;;  %v229_v33 = vmax.f32 %v203_v31, 0.0 }
  0xf4   :  { %v212_v26 = vpop.f32.mrb[11].mxu0  ;;  %v218_v38 = vadd.f32 %v2040_v25, %v2724_v3 }
  0xf5   :  { %1944 = vmatmul.mubr.msk.f32.gmra.mrb[20].mxu0 %vm33_vm1, %v225_v23  ;;  %v213_v35 = vadd.f32 %v2724_v3, %v212_v26 }
  0xf6   :  { %392 = vmatprep.mubr.f32.mxu0 %v2484_v42  ;;  %v232_v39 = vmax.f32 %v218_v38, 0.0 }
  0xf7   :  { %v231_v37 = vmax.f32 %v213_v35, 0.0 }
  0xf9   :  { %1945 = vmatmul.mubr.msk.f32.gmra.mrb[22].mxu0 %vm33_vm1, %v226_v28 }
  0xfa   :  { %398 = vmatprep.mubr.f32.mxu0 %v2484_v42 }
  0xfd   :  { %1946 = vmatmul.mubr.msk.f32.gmra.mrb[24].mxu0 %vm33_vm1, %v227_v29 }
  0xfe   :  { %404 = vmatprep.mubr.f32.mxu0 %v2484_v42 }
 0x101   :  { %1947 = vmatmul.mubr.msk.f32.gmra.mrb[26].mxu0 %vm33_vm1, %v228_v32 }
 0x102   :  { %410 = vmatprep.mubr.f32.mxu0 %v2484_v42 }
 0x105   :  { %1948 = vmatmul.mubr.msk.f32.gmra.mrb[28].mxu0 %vm33_vm1, %v229_v33 }
 0x106   :  { %416 = vmatprep.mubr.f32.mxu0 %v2484_v42 }
 0x109   :  { %1949 = vmatmul.mubr.msk.f32.gmra.mrb[30].mxu0 %vm33_vm1, %v230_v36 }
 0x10a   :  { %422 = vmatprep.mubr.f32.mxu0 %v2484_v42 }
 0x10d   :  { %1950 = vmatmul.mubr.msk.f32.gmra.mrb[32].mxu0 %vm33_vm1, %v231_v37 }
 0x10e   :  { %428 = vmatprep.mubr.f32.mxu0 %v2484_v42 }
 0x111   :  { %1951 = vmatmul.mubr.msk.f32.gmra.mrb[34].mxu0 %vm33_vm1, %v232_v39 }
 0x112   :  { %549 = vmatprep.mubr.f32.mxu0 %v2484_v42 }
 0x115   :  { %1952 = vmatmul.mubr.msk.f32.vlgmr.msra.gmra.mrb[12].mxu0 %vm33_vm1, %v475_v40 }
 0x116   :  { %2103 = vmatpush1.bf16.msra.mxu0 %v2661_v48  ;;  %664 = vmatprep.mubr.f32.mxu0 %v2484_v42 }
 0x117   :  { %2105 = vmatprep.subr.bf16.mxu0 %v2672_v51 }
 0x11a   :  { %2107 = vmatpush1.bf16.msra.mxu0 %v2681_v54 }
 0x11b   :  { %2109 = vmatprep.subr.bf16.mxu0 %v2690_v57 }
 0x11e   :  { %2111 = vmatpush1.bf16.msra.mxu0 %v2699_v60 }
 0x11f   :  { %2113 = vmatprep.subr.bf16.mxu0 %v2708_v63 }
 0x122   :  { %2115 = vmatpush1.bf16.msra.mxu0 %v2717_v2 }
 0x123   :  { %2117 = vmatprep.subr.bf16.mxu0 %v2653_v45 }
 0x1c4   :  { %v2780_v41 = vpop.f32.mrb[18].mxu0 }
 0x1c5   :  { %v2782_v43 = vpop.f32.mrb[19].mxu0 }
 0x1c8   :  { %v2784_v44 = vpop.f32.mrb[20].mxu0 }
 0x1c9   :  { %v2786_v46 = vpop.f32.mrb[21].mxu0 }
 0x1cc   :  { %v2788_v47 = vpop.f32.mrb[22].mxu0 }
 0x1cd   :  { %v2790_v49 = vpop.f32.mrb[23].mxu0 }
 0x1d0   :  { %v2792_v50 = vpop.f32.mrb[24].mxu0 }
 0x1d1   :  { %v2794_v52 = vpop.f32.mrb[25].mxu0 }
 0x1d4   :  { %v2796_v53 = vpop.f32.mrb[26].mxu0 }
 0x1d5   :  { %v2798_v55 = vpop.f32.mrb[27].mxu0 }
 0x1d8   :  { %v2800_v56 = vpop.f32.mrb[28].mxu0 }
 0x1d9   :  { %v2802_v58 = vpop.f32.mrb[29].mxu0 }
 0x1dc   :  { %v2804_v61 = vpop.f32.mrb[30].mxu0 }
 0x1dd   :  { %v2806_v62 = vpop.f32.mrb[31].mxu0 }
 0x1e0   :  { %v2808_v1 = vpop.f32.mrb[32].mxu0 }
 0x1e1   :  { %v2810_v3 = vpop.f32.mrb[33].mxu0 }
 0x1e4   :  { %v2812_v5 = vpop.f32.mrb[34].mxu0 }
 0x1e5   :  { %v2817_v7 = vpop.f32.mrb[35].mxu0 }
 0x1e8   :  { %v551_v9 = vpop.f32.mrb[12].mxu0 }
 0x1e9   :  { %v553_v10 = vpop.f32.mrb[13].mxu0  ;;  %v2288_v16 = vadd.f32 %v551_v9, %v2824_v15 }
 0x1ea   :  { %v2289_v11 = vadd.f32 %v553_v10, %v2819_v8 }
 0x1eb   :  { %v1953_v17 = vmul.f32 -1.442695, %v2288_v16 }
 0x1ec   :  { %2340 = vtanh.f32 %v2289_v11  ;;  %v1954_v28 = vmul.f32 -1.442695, %v2289_v11 }
 0x1ed   :  { %2342 = vpow2.f32 %v1953_v17 }
 0x1f6   :  { %v2341_v12 = vpop.eup %2340 }
 0x1f7   :  { %577 = vrot.lane.b32.xlu0 %v2341_v12, %s2485_s29  ;;  %v2343_v18 = vpop.eup %2342 }
 0x1f8   :  { %v564_v19 = vadd.f32 1.0, %v2343_v18 }
 0x1fa   :  { %2344 = vrcp.f32 %v564_v19 }
 0x1fb   :  { %572 = vrot.lane.b32.xlu0 %v476_v13, %s2485_s29 }
 0x204   :  { %v2345_v20 = vpop.eup %2344 }
 0x269   :  { %v578_v21 = vpop.permute.xlu0 %577 }
 0x26a   :  { %v580_v22 = vmul.f32 %v2345_v20, %v578_v21 }
 0x26c   :  { %582 = vrot.lane.b32.xlu1 %v580_v22, %s2485_s29 }
 0x26d   :  { %v573_v23 = vpop.permute.xlu0 %572 }
 0x26e   :  { %v575_v24 = vmul.f32 %v2345_v20, %v573_v23 }
 0x2de   :  { %v583_v25 = vpop.permute.xlu1 %582 }
 0x2df   :  { %v585_v26 = vadd.f32 %v583_v25, %v575_v24 }
 0x2e1   :  { %2346 = vtanh.f32 %v585_v26 }
 0x2e2   :  { %2348 = vpow2.f32 %v1954_v28 }
 0x2eb   :  { %v2347_v27 = vpop.eup %2346 }
 0x2ec   :  { %588 = vrot.lane.b32.xlu1 %v2347_v27, %s2485_s29  ;;  %v2349_v29 = vpop.eup %2348 }
 0x2ed   :  { %v565_v30 = vadd.f32 1.0, %v2349_v29 }
 0x2ef   :  { %2350 = vrcp.f32 %v565_v30 }
 0x2f9   :  { %v2351_v31 = vpop.eup %2350 }
 0x35e   :  { %v589_v32 = vpop.permute.xlu1 %588 }
 0x35f   :  { %v591_v33 = vmul.f32 %v2351_v31, %v589_v32 }
 0x361   :  { %1955 = vmatmul.mubr.msk.f32.vlgmr.msra.gmra.mrb[14].mxu0 %vm33_vm1, %v591_v33 }
 0x362   :  { %2119 = vmatpush1.bf16.msra.mxu0 %v2661_v48  ;;  %775 = vmatprep.mubr.f32.mxu0 %v2484_v42 }
 0x363   :  { %2121 = vmatprep.subr.bf16.mxu0 %v2672_v51 }
 0x366   :  { %2123 = vmatpush1.bf16.msra.mxu0 %v2681_v54 }
 0x367   :  { %2125 = vmatprep.subr.bf16.mxu0 %v2690_v57 }
 0x36a   :  { %2127 = vmatpush1.bf16.msra.mxu0 %v2699_v60 }
 0x36b   :  { %2129 = vmatprep.subr.bf16.mxu0 %v2708_v63 }
 0x36e   :  { %2131 = vmatpush1.bf16.msra.mxu0 %v2717_v2 }
 0x434   :  { %v666_v34 = vpop.f32.mrb[14].mxu0 }
 0x435   :  { %v668_v35 = vpop.f32.mrb[15].mxu0  ;;  %v2290_v38 = vadd.f32 %v666_v34, %v2824_v15 }
 0x436   :  { %v2291_v36 = vadd.f32 %v668_v35, %v2819_v8 }
 0x437   :  { %v1956_v39 = vmul.f32 -1.442695, %v2290_v38 }
 0x438   :  { %2352 = vtanh.f32 %v2291_v36  ;;  %v1957_v13 = vmul.f32 -1.442695, %v2291_v36 }
 0x439   :  { %2354 = vpow2.f32 %v1956_v39 }
 0x442   :  { %v2353_v37 = vpop.eup %2352 }
 0x443   :  { %688 = vrot.lane.b32.xlu0 %v2353_v37, %s2485_s29  ;;  %v2355_v40 = vpop.eup %2354 }
 0x444   :  { %v679_v59 = vadd.f32 1.0, %v2355_v40 }
 0x446   :  { %2356 = vrcp.f32 %v679_v59  ;;  %v383_v59 = vadd.f32 %v2780_v41, %v2824_v15 }
 0x450   :  { %v2357_v0 = vpop.eup %2356 }
 0x451   :  { %v686_v9 = vmul.f32 %v2357_v0, %v585_v26 }
 0x4b5   :  { %v689_v4 = vpop.permute.xlu0 %688 }
 0x4b6   :  { %v691_v6 = vmul.f32 %v2357_v0, %v689_v4  ;;  %v385_v0 = vadd.f32 %v2782_v43, %v2819_v8 }
 0x4b8   :  { %693 = vrot.lane.b32.xlu1 %v691_v6, %s2485_s29 }
 0x52a   :  { %v694_v10 = vpop.permute.xlu1 %693 }
 0x52b   :  { %v696_v11 = vadd.f32 %v694_v10, %v686_v9 }
 0x52d   :  { %2358 = vtanh.f32 %v696_v11 }
 0x52e   :  { %2360 = vpow2.f32 %v1957_v13 }
 0x537   :  { %v2359_v12 = vpop.eup %2358 }
 0x538   :  { %699 = vrot.lane.b32.xlu0 %v2359_v12, %s2485_s29  ;;  %v2361_v14 = vpop.eup %2360 }
 0x539   :  { %v680_v16 = vadd.f32 1.0, %v2361_v14 }
 0x53b   :  { %2362 = vrcp.f32 %v680_v16 }
 0x545   :  { %v2363_v17 = vpop.eup %2362 }
 0x5aa   :  { %v700_v18 = vpop.permute.xlu0 %699 }
 0x5ab   :  { %v702_v19 = vmul.f32 %v2363_v17, %v700_v18 }
 0x5ad   :  { %1958 = vmatmul.mubr.msk.f32.vlgmr.msra.gmra.mrb[16].mxu0 %vm33_vm1, %v702_v19 }
 0x5ae   :  { %2057 = vmatprep.mubr.msk.f32.mxu0 %vm2487_vm2, %v2484_v42 }
 0x680   :  { %v777_v20 = vpop.f32.mrb[16].mxu0 }
 0x681   :  { %v779_v21 = vpop.f32.mrb[17].mxu0  ;;  %v2292_v24 = vadd.f32 %v777_v20, %v2824_v15 }
 0x682   :  { %v2293_v22 = vadd.f32 %v779_v21, %v2819_v8 }
 0x683   :  { %v1959_v25 = vmul.f32 -1.442695, %v2292_v24 }
 0x684   :  { %2364 = vtanh.f32 %v2293_v22  ;;  %v1960_v35 = vmul.f32 -1.442695, %v2293_v22 }
 0x685   :  { %2366 = vpow2.f32 %v1959_v25 }
 0x68e   :  { %v2365_v23 = vpop.eup %2364 }
 0x68f   :  { %799 = vrot.lane.b32.xlu1 %v2365_v23, %s2485_s29  ;;  %v2367_v26 = vpop.eup %2366 }
 0x690   :  { %v790_v27 = vadd.f32 1.0, %v2367_v26 }
 0x692   :  { %2368 = vrcp.f32 %v790_v27  ;;  %v389_v27 = vadd.f32 %v2784_v44, %v2824_v15 }
 0x69c   :  { %v2369_v28 = vpop.eup %2368 }
 0x69d   :  { %v797_v31 = vmul.f32 %v2369_v28, %v696_v11 }
 0x701   :  { %v800_v29 = vpop.permute.xlu1 %799 }
 0x702   :  { %v802_v30 = vmul.f32 %v2369_v28, %v800_v29  ;;  %v391_v28 = vadd.f32 %v2786_v46, %v2819_v8 }
 0x704   :  { %804 = vrot.lane.b32.xlu0 %v802_v30, %s2485_s29 }
 0x776   :  { %v805_v32 = vpop.permute.xlu0 %804 }
 0x777   :  { %v807_v33 = vadd.f32 %v805_v32, %v797_v31 }
 0x779   :  { %2370 = vtanh.f32 %v807_v33 }
 0x77a   :  { %2372 = vpow2.f32 %v1960_v35 }
 0x783   :  { %v2371_v34 = vpop.eup %2370 }
 0x784   :  { %810 = vrot.lane.b32.xlu1 %v2371_v34, %s2485_s29  ;;  %v2373_v36 = vpop.eup %2372 }
 0x785   :  { %v791_v37 = vadd.f32 1.0, %v2373_v36 }
 0x787   :  { %2374 = vrcp.f32 %v791_v37 }
 0x791   :  { %v2375_v38 = vpop.eup %2374 }
 0x7f6   :  { %v811_v39 = vpop.permute.xlu1 %810 }
 0x7f7   :  { %v813_v40 = vmul.f32 %v2375_v38, %v811_v39 }
 0x7f9   :  { %1961 = vmatmul.mubr.msk.f32.vlgmr.msra.gmra.mrb[0].mxu1 %vm33_vm1, %v813_v40 }
 0x7fa   :  { %2151 = vmatpush1.bf16.msra.mxu1 %v2661_v48  ;;  %997 = vmatprep.mubr.f32.mxu1 %v2484_v42 }
 0x7fb   :  { %2153 = vmatprep.subr.bf16.mxu1 %v2672_v51 }
 0x7fe   :  { %2155 = vmatpush1.bf16.msra.mxu1 %v2681_v54 }
 0x7ff   :  { %2157 = vmatprep.subr.bf16.mxu1 %v2690_v57 }
 0x802   :  { %2159 = vmatpush1.bf16.msra.mxu1 %v2699_v60 }
 0x803   :  { %2161 = vmatprep.subr.bf16.mxu1 %v2708_v63 }
 0x806   :  { %2163 = vmatpush1.bf16.msra.mxu1 %v2717_v2 }
 0x807   :  { %2165 = vmatprep.subr.bf16.mxu1 %v2653_v45 }
 0x8cc   :  { %v888_v4 = vpop.f32.mrb[0].mxu1 }
 0x8cd   :  { %v893_v6 = vadd.f32 %v888_v4, %v383_v59  ;;  %v890_v9 = vpop.f32.mrb[1].mxu1 }
 0x8ce   :  { %v894_v10 = vadd.f32 %v890_v9, %v385_v0 }
 0x8cf   :  { %v1962_v12 = vmul.f32 -1.442695, %v893_v6 }
 0x8d0   :  { %2376 = vtanh.f32 %v894_v10  ;;  %v1963_v21 = vmul.f32 -1.442695, %v894_v10 }
 0x8d1   :  { %2378 = vpow2.f32 %v1962_v12  ;;  %v395_v12 = vadd.f32 %v2788_v47, %v2824_v15 }
 0x8da   :  { %v2377_v11 = vpop.eup %2376 }
 0x8db   :  { %910 = vrot.lane.b32.xlu0 %v2377_v11, %s2485_s29  ;;  %v2379_v13 = vpop.eup %2378 }
 0x8dc   :  { %v901_v14 = vadd.f32 1.0, %v2379_v13  ;;  %v397_v13 = vadd.f32 %v2790_v49, %v2819_v8 }
 0x8de   :  { %2380 = vrcp.f32 %v901_v14 }
 0x8e8   :  { %v2381_v16 = vpop.eup %2380 }
 0x8e9   :  { %v908_v41 = vmul.f32 %v2381_v16, %v807_v33 }
 0x94d   :  { %v911_v17 = vpop.permute.xlu0 %910 }
 0x94e   :  { %v913_v18 = vmul.f32 %v2381_v16, %v911_v17 }
 0x950   :  { %915 = vrot.lane.b32.xlu1 %v913_v18, %s2485_s29 }
 0x9c2   :  { %v916_v43 = vpop.permute.xlu1 %915 }
 0x9c3   :  { %v918_v19 = vadd.f32 %v916_v43, %v908_v41 }
 0x9c5   :  { %2382 = vtanh.f32 %v918_v19 }
 0x9c6   :  { %2384 = vpow2.f32 %v1963_v21 }
 0x9cf   :  { %v2383_v20 = vpop.eup %2382 }
 0x9d0   :  { %921 = vrot.lane.b32.xlu0 %v2383_v20, %s2485_s29  ;;  %v2385_v22 = vpop.eup %2384 }
 0x9d1   :  { %v902_v23 = vadd.f32 1.0, %v2385_v22 }
 0x9d3   :  { %2386 = vrcp.f32 %v902_v23 }
 0x9dd   :  { %v2387_v24 = vpop.eup %2386 }
 0xa42   :  { %v922_v25 = vpop.permute.xlu0 %921 }
 0xa43   :  { %v924_v26 = vmul.f32 %v2387_v24, %v922_v25 }
 0xa45   :  { %1964 = vmatmul.mubr.msk.f32.vlgmr.msra.gmra.mrb[2].mxu1 %vm33_vm1, %v924_v26 }
 0xa46   :  { %2167 = vmatpush1.bf16.msra.mxu1 %v2661_v48  ;;  %1108 = vmatprep.mubr.f32.mxu1 %v2484_v42 }
 0xa47   :  { %2169 = vmatprep.subr.bf16.mxu1 %v2672_v51 }
 0xa4a   :  { %2171 = vmatpush1.bf16.msra.mxu1 %v2681_v54 }
 0xa4b   :  { %2173 = vmatprep.subr.bf16.mxu1 %v2690_v57 }
 0xa4e   :  { %2175 = vmatpush1.bf16.msra.mxu1 %v2699_v60 }
 0xa4f   :  { %2177 = vmatprep.subr.bf16.mxu1 %v2708_v63 }
 0xa52   :  { %2179 = vmatpush1.bf16.msra.mxu1 %v2717_v2 }
 0xa53   :  { %2181 = vmatprep.subr.bf16.mxu1 %v2653_v45 }
 0xb18   :  { %v999_v29 = vpop.f32.mrb[2].mxu1 }
 0xb19   :  { %v1004_v30 = vadd.f32 %v999_v29, %v389_v27  ;;  %v1001_v31 = vpop.f32.mrb[3].mxu1 }
 0xb1a   :  { %v1005_v32 = vadd.f32 %v1001_v31, %v391_v28 }
 0xb1b   :  { %v1965_v34 = vmul.f32 -1.442695, %v1004_v30 }
 0xb1c   :  { %2388 = vtanh.f32 %v1005_v32  ;;  %v1966_v0 = vmul.f32 -1.442695, %v1005_v32  ;;  %v401_v32 = vadd.f32 %v2792_v50, %v2824_v15 }
 0xb1d   :  { %2390 = vpow2.f32 %v1965_v34 }
 0xb26   :  { %v2389_v33 = vpop.eup %2388 }
 0xb27   :  { %1021 = vrot.lane.b32.xlu1 %v2389_v33, %s2485_s29  ;;  %v2391_v35 = vpop.eup %2390  ;;  %v403_v33 = vadd.f32 %v2794_v52, %v2819_v8 }
 0xb28   :  { %v1012_v36 = vadd.f32 1.0, %v2391_v35 }
 0xb2a   :  { %2392 = vrcp.f32 %v1012_v36 }
 0xb34   :  { %v2393_v37 = vpop.eup %2392 }
 0xb35   :  { %v1019_v44 = vmul.f32 %v2393_v37, %v918_v19 }
 0xb99   :  { %v1022_v38 = vpop.permute.xlu1 %1021 }
 0xb9a   :  { %v1024_v39 = vmul.f32 %v2393_v37, %v1022_v38 }
 0xb9c   :  { %1026 = vrot.lane.b32.xlu0 %v1024_v39, %s2485_s29 }
 0xc0e   :  { %v1027_v46 = vpop.permute.xlu0 %1026 }
 0xc0f   :  { %v1029_v40 = vadd.f32 %v1027_v46, %v1019_v44 }
 0xc11   :  { %2394 = vtanh.f32 %v1029_v40 }
 0xc12   :  { %2396 = vpow2.f32 %v1966_v0 }
 0xc1b   :  { %v2395_v59 = vpop.eup %2394 }
 0xc1c   :  { %1032 = vrot.lane.b32.xlu1 %v2395_v59, %s2485_s29  ;;  %v2397_v4 = vpop.eup %2396 }
 0xc1d   :  { %v1013_v6 = vadd.f32 1.0, %v2397_v4 }
 0xc1f   :  { %2398 = vrcp.f32 %v1013_v6 }
 0xc29   :  { %v2399_v9 = vpop.eup %2398 }
 0xc8e   :  { %v1033_v10 = vpop.permute.xlu1 %1032 }
 0xc8f   :  { %v1035_v11 = vmul.f32 %v2399_v9, %v1033_v10 }
 0xc91   :  { %1967 = vmatmul.mubr.msk.f32.vlgmr.msra.gmra.mrb[4].mxu1 %vm33_vm1, %v1035_v11 }
 0xc92   :  { %2183 = vmatpush1.bf16.msra.mxu1 %v2661_v48  ;;  %1219 = vmatprep.mubr.f32.mxu1 %v2484_v42 }
 0xc93   :  { %2185 = vmatprep.subr.bf16.mxu1 %v2672_v51 }
 0xc96   :  { %2187 = vmatpush1.bf16.msra.mxu1 %v2681_v54 }
 0xc97   :  { %2189 = vmatprep.subr.bf16.mxu1 %v2690_v57 }
 0xc9a   :  { %2191 = vmatpush1.bf16.msra.mxu1 %v2699_v60 }
 0xc9b   :  { %2193 = vmatprep.subr.bf16.mxu1 %v2708_v63 }
 0xc9e   :  { %2195 = vmatpush1.bf16.msra.mxu1 %v2717_v2 }
 0xc9f   :  { %2197 = vmatprep.subr.bf16.mxu1 %v2653_v45 }
 0xd64   :  { %v1110_v14 = vpop.f32.mrb[4].mxu1 }
 0xd65   :  { %v1115_v16 = vadd.f32 %v1110_v14, %v395_v12  ;;  %v1112_v17 = vpop.f32.mrb[5].mxu1 }
 0xd66   :  { %v1116_v18 = vadd.f32 %v1112_v17, %v397_v13  ;;  %v409_v17 = vadd.f32 %v2798_v55, %v2819_v8 }
 0xd67   :  { %v1968_v43 = vmul.f32 -1.442695, %v1115_v16  ;;  %v407_v16 = vadd.f32 %v2796_v53, %v2824_v15 }
 0xd68   :  { %2400 = vtanh.f32 %v1116_v18  ;;  %v1969_v26 = vmul.f32 -1.442695, %v1116_v18 }
 0xd69   :  { %2402 = vpow2.f32 %v1968_v43 }
 0xd72   :  { %v2401_v41 = vpop.eup %2400 }
 0xd73   :  { %1132 = vrot.lane.b32.xlu0 %v2401_v41, %s2485_s29  ;;  %v2403_v19 = vpop.eup %2402 }
 0xd74   :  { %v1123_v20 = vadd.f32 1.0, %v2403_v19 }
 0xd76   :  { %2404 = vrcp.f32 %v1123_v20 }
 0xd80   :  { %v2405_v21 = vpop.eup %2404 }
 0xd81   :  { %v1130_v47 = vmul.f32 %v2405_v21, %v1029_v40 }
 0xde5   :  { %v1133_v22 = vpop.permute.xlu0 %1132 }
 0xde6   :  { %v1135_v23 = vmul.f32 %v2405_v21, %v1133_v22 }
 0xde8   :  { %1137 = vrot.lane.b32.xlu1 %v1135_v23, %s2485_s29 }
 0xe5a   :  { %v1138_v49 = vpop.permute.xlu1 %1137 }
 0xe5b   :  { %v1140_v24 = vadd.f32 %v1138_v49, %v1130_v47 }
 0xe5d   :  { %2406 = vtanh.f32 %v1140_v24 }
 0xe5e   :  { %2408 = vpow2.f32 %v1969_v26 }
 0xe67   :  { %v2407_v25 = vpop.eup %2406 }
 0xe68   :  { %1143 = vrot.lane.b32.xlu0 %v2407_v25, %s2485_s29  ;;  %v2409_v27 = vpop.eup %2408 }
 0xe69   :  { %v1124_v28 = vadd.f32 1.0, %v2409_v27 }
 0xe6b   :  { %2410 = vrcp.f32 %v1124_v28 }
 0xe75   :  { %v2411_v29 = vpop.eup %2410 }
 0xeda   :  { %v1144_v30 = vpop.permute.xlu0 %1143 }
 0xedb   :  { %v1146_v31 = vmul.f32 %v2411_v29, %v1144_v30 }
 0xedd   :  { %1970 = vmatmul.mubr.msk.f32.vlgmr.msra.gmra.mrb[6].mxu1 %vm33_vm1, %v1146_v31 }
 0xede   :  { %2199 = vmatpush1.bf16.msra.mxu1 %v2661_v48  ;;  %1330 = vmatprep.mubr.f32.mxu1 %v2484_v42 }
 0xedf   :  { %2201 = vmatprep.subr.bf16.mxu1 %v2672_v51 }
 0xee2   :  { %2203 = vmatpush1.bf16.msra.mxu1 %v2681_v54 }
 0xee3   :  { %2205 = vmatprep.subr.bf16.mxu1 %v2690_v57 }
 0xee6   :  { %2207 = vmatpush1.bf16.msra.mxu1 %v2699_v60 }
 0xee7   :  { %2209 = vmatprep.subr.bf16.mxu1 %v2708_v63 }
 0xeea   :  { %2211 = vmatpush1.bf16.msra.mxu1 %v2717_v2 }
 0xeeb   :  { %2213 = vmatprep.subr.bf16.mxu1 %v2653_v45 }
 0xfb0   :  { %v1221_v34 = vpop.f32.mrb[6].mxu1 }
 0xfb1   :  { %v1226_v35 = vadd.f32 %v1221_v34, %v401_v32  ;;  %v1223_v36 = vpop.f32.mrb[7].mxu1  ;;  %v415_v34 = vadd.f32 %v2802_v58, %v2819_v8 }
 0xfb2   :  { %v1227_v37 = vadd.f32 %v1223_v36, %v403_v33  ;;  %v413_v33 = vadd.f32 %v2800_v56, %v2824_v15 }
 0xfb3   :  { %v1971_v39 = vmul.f32 -1.442695, %v1226_v35 }
 0xfb4   :  { %2412 = vtanh.f32 %v1227_v37  ;;  %v1972_v9 = vmul.f32 -1.442695, %v1227_v37 }
 0xfb5   :  { %2414 = vpow2.f32 %v1971_v39 }
 0xfbe   :  { %v2413_v38 = vpop.eup %2412 }
 0xfbf   :  { %1243 = vrot.lane.b32.xlu1 %v2413_v38, %s2485_s29  ;;  %v2415_v44 = vpop.eup %2414 }
 0xfc0   :  { %v1234_v46 = vadd.f32 1.0, %v2415_v44 }
 0xfc2   :  { %2416 = vrcp.f32 %v1234_v46 }
 0xfcc   :  { %v2417_v40 = vpop.eup %2416 }
 0xfcd   :  { %v1241_v50 = vmul.f32 %v2417_v40, %v1140_v24 }
0x1031   :  { %v1244_v59 = vpop.permute.xlu1 %1243 }
0x1032   :  { %v1246_v0 = vmul.f32 %v2417_v40, %v1244_v59 }
0x1034   :  { %1248 = vrot.lane.b32.xlu0 %v1246_v0, %s2485_s29 }
0x10a6   :  { %v1249_v52 = vpop.permute.xlu0 %1248 }
0x10a7   :  { %v1251_v4 = vadd.f32 %v1249_v52, %v1241_v50 }
0x10a9   :  { %2418 = vtanh.f32 %v1251_v4 }
0x10aa   :  { %2420 = vpow2.f32 %v1972_v9 }
0x10b3   :  { %v2419_v6 = vpop.eup %2418 }
0x10b4   :  { %1254 = vrot.lane.b32.xlu1 %v2419_v6, %s2485_s29  ;;  %v2421_v10 = vpop.eup %2420 }
0x10b5   :  { %v1235_v11 = vadd.f32 1.0, %v2421_v10 }
0x10b7   :  { %2422 = vrcp.f32 %v1235_v11 }
0x10c1   :  { %v2423_v12 = vpop.eup %2422 }
0x1126   :  { %v1255_v13 = vpop.permute.xlu1 %1254 }
0x1127   :  { %v1257_v14 = vmul.f32 %v2423_v12, %v1255_v13 }
0x1129   :  { %1973 = vmatmul.mubr.msk.f32.vlgmr.msra.gmra.mrb[8].mxu1 %vm33_vm1, %v1257_v14  ;;  %v419_v14 = vadd.f32 %v2804_v61, %v2824_v15 }
0x112a   :  { %2215 = vmatpush1.bf16.msra.mxu1 %v2661_v48  ;;  %1441 = vmatprep.mubr.f32.mxu1 %v2484_v42 }
0x112b   :  { %2217 = vmatprep.subr.bf16.mxu1 %v2672_v51 }
0x112e   :  { %2219 = vmatpush1.bf16.msra.mxu1 %v2681_v54 }
0x112f   :  { %2221 = vmatprep.subr.bf16.mxu1 %v2690_v57 }
0x1132   :  { %2223 = vmatpush1.bf16.msra.mxu1 %v2699_v60 }
0x1133   :  { %2225 = vmatprep.subr.bf16.mxu1 %v2708_v63 }
0x1136   :  { %2227 = vmatpush1.bf16.msra.mxu1 %v2717_v2 }
0x1137   :  { %2229 = vmatprep.subr.bf16.mxu1 %v2653_v45 }
0x11fc   :  { %v1332_v18 = vpop.f32.mrb[8].mxu1 }
0x11fd   :  { %v1337_v41 = vadd.f32 %v1332_v18, %v407_v16  ;;  %v1334_v43 = vpop.f32.mrb[9].mxu1  ;;  %v421_v16 = vadd.f32 %v2806_v62, %v2819_v8 }
0x11fe   :  { %v1338_v19 = vadd.f32 %v1334_v43, %v409_v17 }
0x11ff   :  { %v1974_v21 = vmul.f32 -1.442695, %v1337_v41 }
0x1200   :  { %2424 = vtanh.f32 %v1338_v19  ;;  %v1975_v27 = vmul.f32 -1.442695, %v1338_v19 }
0x1201   :  { %2426 = vpow2.f32 %v1974_v21 }
0x120a   :  { %v2425_v20 = vpop.eup %2424 }
0x120b   :  { %1354 = vrot.lane.b32.xlu0 %v2425_v20, %s2485_s29  ;;  %v2427_v22 = vpop.eup %2426 }
0x120c   :  { %v1345_v23 = vadd.f32 1.0, %v2427_v22 }
0x120e   :  { %2428 = vrcp.f32 %v1345_v23 }
0x1218   :  { %v2429_v47 = vpop.eup %2428 }
0x1219   :  { %v1352_v53 = vmul.f32 %v2429_v47, %v1251_v4 }
0x127d   :  { %v1355_v49 = vpop.permute.xlu0 %1354 }
0x127e   :  { %v1357_v24 = vmul.f32 %v2429_v47, %v1355_v49 }
0x1280   :  { %1359 = vrot.lane.b32.xlu1 %v1357_v24, %s2485_s29 }
0x12f2   :  { %v1360_v55 = vpop.permute.xlu1 %1359 }
0x12f3   :  { %v1362_v25 = vadd.f32 %v1360_v55, %v1352_v53 }
0x12f5   :  { %2430 = vtanh.f32 %v1362_v25 }
0x12f6   :  { %2432 = vpow2.f32 %v1975_v27 }
0x12ff   :  { %v2431_v26 = vpop.eup %2430 }
0x1300   :  { %1365 = vrot.lane.b32.xlu0 %v2431_v26, %s2485_s29  ;;  %v2433_v28 = vpop.eup %2432 }
0x1301   :  { %v1346_v29 = vadd.f32 1.0, %v2433_v28 }
0x1303   :  { %2434 = vrcp.f32 %v1346_v29  ;;  %v425_v29 = vadd.f32 %v2808_v1, %v2824_v15 }
0x130d   :  { %v2435_v30 = vpop.eup %2434 }
0x1372   :  { %v1366_v31 = vpop.permute.xlu0 %1365 }
0x1373   :  { %v1368_v32 = vmul.f32 %v2435_v30, %v1366_v31 }
0x1375   :  { %1976 = vmatmul.mubr.msk.f32.vlgmr.msra.gmra.mrb[10].mxu1 %vm33_vm1, %v1368_v32 }
0x1376   :  { %2231 = vmatpush1.bf16.msra.mxu1 %v2661_v48  ;;  %1552 = vmatprep.mubr.f32.mxu1 %v2484_v42 }
0x1377   :  { %2233 = vmatprep.subr.bf16.mxu1 %v2672_v51 }
0x137a   :  { %2235 = vmatpush1.bf16.msra.mxu1 %v2681_v54 }
0x137b   :  { %2237 = vmatprep.subr.bf16.mxu1 %v2690_v57 }
0x137e   :  { %2239 = vmatpush1.bf16.msra.mxu1 %v2699_v60 }
0x137f   :  { %2241 = vmatprep.subr.bf16.mxu1 %v2708_v63 }
0x1382   :  { %2243 = vmatpush1.bf16.msra.mxu1 %v2717_v2 }
0x1383   :  { %2245 = vmatprep.subr.bf16.mxu1 %v2653_v45 }
0x1448   :  { %v1443_v35 = vpop.f32.mrb[10].mxu1 }
0x1449   :  { %v1448_v36 = vadd.f32 %v1443_v35, %v413_v33  ;;  %v1445_v37 = vpop.f32.mrb[11].mxu1 }
0x144a   :  { %v1449_v38 = vadd.f32 %v1445_v37, %v415_v34 }
0x144b   :  { %v1977_v44 = vmul.f32 -1.442695, %v1448_v36 }
0x144c   :  { %2436 = vtanh.f32 %v1449_v38  ;;  %v1978_v6 = vmul.f32 -1.442695, %v1449_v38 }
0x144d   :  { %2438 = vpow2.f32 %v1977_v44 }
0x1456   :  { %v2437_v39 = vpop.eup %2436 }
0x1457   :  { %1465 = vrot.lane.b32.xlu1 %v2437_v39, %s2485_s29  ;;  %v2439_v46 = vpop.eup %2438 }
0x1458   :  { %v1456_v40 = vadd.f32 1.0, %v2439_v46 }
0x145a   :  { %2440 = vrcp.f32 %v1456_v40 }
0x1464   :  { %v2441_v59 = vpop.eup %2440 }
0x1465   :  { %v1463_v56 = vmul.f32 %v2441_v59, %v1362_v25 }
0x14c9   :  { %v1466_v0 = vpop.permute.xlu1 %1465 }
0x14ca   :  { %v1468_v50 = vmul.f32 %v2441_v59, %v1466_v0  ;;  %v431_v59 = vadd.f32 %v2812_v5, %v2824_v15  ;;  %v433_v0 = vadd.f32 %v2817_v7, %v2819_v8  ;;  %v2486_v5 = vmov 0.0|0.0   ;;  %v1823_v7 = vld [vmem:[%s3033_s6] sm:$0xff] }
0x14cb   :  { %2276 = vmatprep.subr.bf16.mxu0 %v2486_v5 }
0x14cc   :  { %1470 = vrot.lane.b32.xlu0 %v1468_v50, %s2485_s29 }
0x153e   :  { %v1471_v58 = vpop.permute.xlu0 %1470 }
0x153f   :  { %v1473_v52 = vadd.f32 %v1471_v58, %v1463_v56 }
0x1541   :  { %2442 = vtanh.f32 %v1473_v52 }
0x1542   :  { %2444 = vpow2.f32 %v1978_v6 }
0x154b   :  { %v2443_v4 = vpop.eup %2442 }
0x154c   :  { %1476 = vrot.lane.b32.xlu1 %v2443_v4, %s2485_s29  ;;  %v2445_v9 = vpop.eup %2444 }
0x154d   :  { %v1457_v10 = vadd.f32 1.0, %v2445_v9 }
0x154f   :  { %2446 = vrcp.f32 %v1457_v10 }
0x1559   :  { %v2447_v11 = vpop.eup %2446 }
0x15be   :  { %v1477_v12 = vpop.permute.xlu1 %1476 }
0x15bf   :  { %v1479_v13 = vmul.f32 %v2447_v11, %v1477_v12 }
0x15c1   :  { %1979 = vmatmul.mubr.msk.f32.vlgmr.msra.gmra.mrb[12].mxu1 %vm33_vm1, %v1479_v13 }
0x15c2   :  { %2247 = vmatpush1.bf16.msra.mxu1 %v2661_v48  ;;  %1663 = vmatprep.mubr.f32.mxu1 %v2484_v42 }
0x15c3   :  { %2249 = vmatprep.subr.bf16.mxu1 %v2672_v51 }
0x15c6   :  { %2251 = vmatpush1.bf16.msra.mxu1 %v2681_v54 }
0x15c7   :  { %2253 = vmatprep.subr.bf16.mxu1 %v2690_v57 }
0x15ca   :  { %2255 = vmatpush1.bf16.msra.mxu1 %v2699_v60 }
0x15cb   :  { %2257 = vmatprep.subr.bf16.mxu1 %v2708_v63 }
0x15ce   :  { %2259 = vmatpush1.bf16.msra.mxu1 %v2717_v2 }
0x15cf   :  { %2261 = vmatprep.subr.bf16.mxu1 %v2653_v45 }
0x1694   :  { %v1554_v17 = vpop.f32.mrb[12].mxu1 }
0x1695   :  { %v1559_v18 = vadd.f32 %v1554_v17, %v419_v14  ;;  %v1556_v41 = vpop.f32.mrb[13].mxu1  ;;  %v1825_v14 = vld [vmem:[%s3033_s6 + $0x10] sm:$0xff] }
0x1696   :  { %v1560_v43 = vadd.f32 %v1556_v41, %v421_v16  ;;  %v1826_v16 = vld [vmem:[%s3033_s6 + $0x18] sm:$0xff]  ;;  %v1828_v41 = vld [vmem:[%s3033_s6 + $0x28] sm:$0xff] }
0x1697   :  { %v1980_v20 = vmul.f32 -1.442695, %v1559_v18  ;;  %v2280_v17 = vpack.c.bf16 %v1826_v16, %v1825_v14  ;;  %v1827_v18 = vld [vmem:[%s3033_s6 + $0x20] sm:$0xff] }
0x1698   :  { %2448 = vtanh.f32 %v1560_v43  ;;  %v1981_v53 = vmul.f32 -1.442695, %v1560_v43  ;;  %v2283_v43 = vpack.c.bf16 %v1828_v41, %v1827_v18 }
0x1699   :  { %2450 = vpow2.f32 %v1980_v20  ;;  %v1829_v20 = vld [vmem:[%s3033_s6 + $0x30] sm:$0xff] }
0x16a2   :  { %v2449_v19 = vpop.eup %2448 }
0x16a3   :  { %1576 = vrot.lane.b32.xlu0 %v2449_v19, %s2485_s29  ;;  %v2451_v21 = vpop.eup %2450 }
0x16a4   :  { %v1567_v22 = vadd.f32 1.0, %v2451_v21  ;;  %v1830_v21 = vld [vmem:[%s3033_s6 + $0x38] sm:$0xff] }
0x16a6   :  { %2452 = vrcp.f32 %v1567_v22 }
0x16b0   :  { %v2453_v45 = vpop.eup %2452 }
0x16b1   :  { %v1574_v61 = vmul.f32 %v2453_v45, %v1473_v52 }
0x1715   :  { %v1577_v23 = vpop.permute.xlu0 %1576 }
0x1716   :  { %v1579_v47 = vmul.f32 %v2453_v45, %v1577_v23  ;;  %v2286_v45 = vpack.c.bf16 %v1830_v21, %v1829_v20 }
0x1718   :  { %1581 = vrot.lane.b32.xlu1 %v1579_v47, %s2485_s29 }
0x178a   :  { %v1582_v62 = vpop.permute.xlu1 %1581 }
0x178b   :  { %v1584_v49 = vadd.f32 %v1582_v62, %v1574_v61 }
0x178d   :  { %2454 = vtanh.f32 %v1584_v49 }
0x178e   :  { %2456 = vpow2.f32 %v1981_v53 }
0x1797   :  { %v2455_v24 = vpop.eup %2454 }
0x1798   :  { %1587 = vrot.lane.b32.xlu0 %v2455_v24, %s2485_s29  ;;  %v2457_v55 = vpop.eup %2456 }
0x1799   :  { %v1568_v25 = vadd.f32 1.0, %v2457_v55 }
0x179b   :  { %2458 = vrcp.f32 %v1568_v25 }
0x17a5   :  { %v2459_v26 = vpop.eup %2458 }
0x180a   :  { %v1588_v27 = vpop.permute.xlu0 %1587 }
0x180b   :  { %v1590_v28 = vmul.f32 %v2459_v26, %v1588_v27 }
0x180d   :  { %1982 = vmatmul.mubr.msk.f32.vlgmr.msra.gmra.mrb[14].mxu1 %vm33_vm1, %v1590_v28 }
0x180e   :  { %2263 = vmatpush1.bf16.msra.mxu1 %v2661_v48  ;;  %1774 = vmatprep.mubr.f32.mxu1 %v2484_v42  ;;  %v427_v48 = vadd.f32 %v2810_v3, %v2819_v8  ;;  %v1824_v8 = vld [vmem:[%s3033_s6 + $0x8] sm:$0xff]  ;;  %v1988_v42 = vld [vmem:[%s3034_s7] ss:$0 sm:$0xff] }
0x180f   :  { %2265 = vmatprep.subr.bf16.mxu1 %v2672_v51  ;;  %v2277_v15 = vpack.c.bf16 %v1824_v8, %v1823_v7 }
0x1811   :  { %2278 = vmatpush3.bf16.msra.mxu0 %v2277_v15 }
0x1812   :  { %2267 = vmatpush1.bf16.msra.mxu1 %v2681_v54  ;;  %2279 = vmatprep.subr.bf16.mxu0 %v2486_v5 }
0x1813   :  { %2269 = vmatprep.subr.bf16.mxu1 %v2690_v57 }
0x1815   :  { %2281 = vmatpush3.bf16.msra.mxu0 %v2280_v17 }
0x1816   :  { %2271 = vmatpush1.bf16.msra.mxu1 %v2699_v60  ;;  %2282 = vmatprep.subr.bf16.mxu0 %v2486_v5 }
0x1817   :  { %2273 = vmatprep.subr.bf16.mxu1 %v2708_v63 }
0x1819   :  { %2284 = vmatpush3.bf16.msra.mxu0 %v2283_v43 }
0x181a   :  { %2275 = vmatpush1.bf16.msra.mxu1 %v2717_v2  ;;  %2285 = vmatprep.subr.bf16.mxu0 %v2486_v5 }
0x181d   :  { %2287 = vmatpush3.bf16.msra.mxu0 %v2286_v45 }
0x18e0   :  { %v1665_v30 = vpop.f32.mrb[14].mxu1 }
0x18e1   :  { %v1670_v31 = vadd.f32 %v1665_v30, %v425_v29  ;;  %v1667_v32 = vpop.f32.mrb[15].mxu1 }
0x18e2   :  { %v1671_v51 = vadd.f32 %v1667_v32, %v427_v48 }
0x18e3   :  { %v1983_v57 = vmul.f32 -1.442695, %v1670_v31 }
0x18e4   :  { %2460 = vtanh.f32 %v1671_v51  ;;  %v1984_v37 = vmul.f32 -1.442695, %v1671_v51 }
0x18e5   :  { %2462 = vpow2.f32 %v1983_v57 }
0x18ee   :  { %v2461_v54 = vpop.eup %2460 }
0x18ef   :  { %1687 = vrot.lane.b32.xlu1 %v2461_v54, %s2485_s29  ;;  %v2463_v60 = vpop.eup %2462 }
0x18f0   :  { %v1678_v63 = vadd.f32 1.0, %v2463_v60 }
0x18f2   :  { %2464 = vrcp.f32 %v1678_v63 }
0x18fc   :  { %v2465_v2 = vpop.eup %2464 }
0x18fd   :  { %v1685_v1 = vmul.f32 %v2465_v2, %v1584_v49 }
0x1961   :  { %v1688_v33 = vpop.permute.xlu1 %1687 }
0x1962   :  { %v1690_v34 = vmul.f32 %v2465_v2, %v1688_v33 }
0x1964   :  { %1692 = vrot.lane.b32.xlu0 %v1690_v34, %s2485_s29 }
0x19d6   :  { %v1693_v3 = vpop.permute.xlu0 %1692 }
0x19d7   :  { %v1695_v35 = vadd.f32 %v1693_v3, %v1685_v1 }
0x19d9   :  { %2466 = vtanh.f32 %v1695_v35 }
0x19da   :  { %2468 = vpow2.f32 %v1984_v37 }
0x19e3   :  { %v2467_v36 = vpop.eup %2466 }
0x19e4   :  { %1698 = vrot.lane.b32.xlu1 %v2467_v36, %s2485_s29  ;;  %v2469_v38 = vpop.eup %2468 }
0x19e5   :  { %v1679_v39 = vadd.f32 1.0, %v2469_v38 }
0x19e7   :  { %2470 = vrcp.f32 %v1679_v39 }
0x19f1   :  { %v2471_v44 = vpop.eup %2470 }
0x1a56   :  { %v1699_v46 = vpop.permute.xlu1 %1698 }
0x1a57   :  { %v1701_v40 = vmul.f32 %v2471_v44, %v1699_v46 }
0x1a59   :  { %1985 = vmatmul.mubr.msk.f32.vlgmr.msra.gmra.mrb[16].mxu1 %vm33_vm1, %v1701_v40 }
0x1b2c   :  { %v1776_v50 = vpop.f32.mrb[16].mxu1 }
0x1b2d   :  { %v1781_v56 = vadd.f32 %v1776_v50, %v431_v59  ;;  %v1778_v58 = vpop.f32.mrb[17].mxu1 }
0x1b2e   :  { %v1782_v52 = vadd.f32 %v1778_v58, %v433_v0 }
0x1b2f   :  { %v1986_v6 = vmul.f32 -1.442695, %v1781_v56 }
0x1b30   :  { %2472 = vtanh.f32 %v1782_v52  ;;  %v1987_v61 = vmul.f32 -1.442695, %v1782_v52 }
0x1b31   :  { %2474 = vpow2.f32 %v1986_v6 }
0x1b3a   :  { %v2473_v4 = vpop.eup %2472 }
0x1b3b   :  { %1798 = vrot.lane.b32.xlu0 %v2473_v4, %s2485_s29  ;;  %v2475_v9 = vpop.eup %2474 }
0x1b3c   :  { %v1789_v10 = vadd.f32 1.0, %v2475_v9 }
0x1b3e   :  { %2476 = vrcp.f32 %v1789_v10 }
0x1b48   :  { %v2477_v11 = vpop.eup %2476 }
0x1b49   :  { %v1796_v19 = vmul.f32 %v2477_v11, %v1695_v35 }
0x1bad   :  { %v1799_v12 = vpop.permute.xlu0 %1798 }
0x1bae   :  { %v1801_v13 = vmul.f32 %v2477_v11, %v1799_v12 }
0x1bb0   :  { %1803 = vrot.lane.b32.xlu1 %v1801_v13, %s2485_s29 }
0x1c22   :  { %v1804_v22 = vpop.permute.xlu1 %1803 }
0x1c23   :  { %v1806_v23 = vadd.f32 %v1804_v22, %v1796_v19 }
0x1c25   :  { %2478 = vtanh.f32 %v1806_v23  ;;  %1815 = vrot.lane.b32.xlu1 %v1806_v23, %s2485_s29 }
0x1c26   :  { %2480 = vpow2.f32 %v1987_v61 }
0x1c2f   :  { %v2479_v47 = vpop.eup %2478 }
0x1c30   :  { %1809 = vrot.lane.b32.xlu0 %v2479_v47, %s2485_s29  ;;  %v2481_v62 = vpop.eup %2480 }
0x1c31   :  { %v1790_v49 = vadd.f32 1.0, %v2481_v62 }
0x1c33   :  { %2482 = vrcp.f32 %v1790_v49 }
0x1c3d   :  { %v2483_v53 = vpop.eup %2482 }
0x1c97   :  { %v1816_v24 = vpop.permute.xlu1 %1815 }
0x1c98   :  { %1818 = vst.msk [vmem:[#allocation4] sm:$0xff] %vm33_vm1, %v1816_v24 }
0x1ca2   :  { %v1810_v55 = vpop.permute.xlu0 %1809 }
0x1ca3   :  { %v1812_v25 = vmul.f32 %v2483_v53, %v1810_v55 }
0x1ca5   :  { %1813 = vst.msk [vmem:[#allocation3] sm:$0xff] %vm33_vm1, %v1812_v25  ;;  %v1822_v26 = vmax.f32 %v1812_v25, 0.0 }
0x1ca7   :  { %2058 = vmatmul.mubr.msk.f32.vlgmr.msra.gmra.mrb[36].mxu0 %vm33_vm1, %v1822_v26 }
0x1d7a   :  { %v1907_v27 = vpop.f32.mrb[36].mxu0 }
0x1d7b   :  { %v1908_v28 = vadd.f32 %v1988_v42, %v1907_v27  ;;  %v2059_v29 = vpop.f32.mrb[37].mxu0 }
0x1d7d   :  { %1911 = vst [vmem:[%s3035_s8] sm:$0xff] %v1908_v28 }

</bundles_post_ra>
